<compile_context>
chip_gen: v7x
topology: tpu7x:2x2x1
jax: 0.10.0
libtpu: 0.0.40
codegen_flags: <defaults>
</compile_context>

<pallas_src>
import functools

import jax
import jax.numpy as jnp
from jax import lax
from jax.experimental import pallas as pl
from jax.experimental.pallas import tpu as pltpu


_VMEM_LIMIT = 32 * 1024 * 1024        # safe on v5e/v6e (128 MiB phys) and v7x (64 MiB phys)
_CHUNK_VMEM_BUDGET = 8 * 1024 * 1024  # operand budget used to derive the time tile


# ----------------------------------------------------------------------------
# Single-buffering of resident weights (pipeline_mode=pl.Buffered(1)), with a
# one-time probe so the script degrades gracefully if unsupported.
# ----------------------------------------------------------------------------
@functools.lru_cache(maxsize=None)
def _single_buffer_supported():
    try:
        def k(x_ref, o_ref):
            o_ref[...] = x_ref[...] * 2.0
        x = jnp.ones((8, 128), jnp.float32)
        out = pl.pallas_call(
            k,
            out_shape=jax.ShapeDtypeStruct((16, 128), jnp.float32),
            grid=(2,),
            in_specs=[pl.BlockSpec((8, 128), lambda i: (0, 0),
                                   pipeline_mode=pl.Buffered(1))],
            out_specs=pl.BlockSpec((8, 128), lambda i: (i, 0)),
        )(x)
        out = jax.block_until_ready(out)
        return bool(jnp.all(out == 2.0))
    except Exception:
        return False


def _resident_spec(shape, index_map):
    """BlockSpec for grid-invariant (weight/bias) operands."""
    if _single_buffer_supported():
        return pl.BlockSpec(shape, index_map, pipeline_mode=pl.Buffered(1))
    return pl.BlockSpec(shape, index_map)


# ----------------------------------------------------------------------------
# Fused bidirectional, time-chunked LSTM layer kernel.
# Grid: (T // TT,), sequential ("arbitrary").
# ----------------------------------------------------------------------------
def _bilstm_chunk_kernel(*refs, num_parts, hidden, tt, batch, fuse):
    H, Bp, n = hidden, batch, num_parts

    pos = 0
    xf_parts = refs[pos:pos + n]; pos += n          # fwd input chunk parts (rows, Hp) bf16
    xb_parts = refs[pos:pos + n]; pos += n          # bwd input chunk parts (rows, Hp) bf16
    wih_f = refs[pos:pos + n]; pos += n             # fwd W_ih^T parts (Hp, 4H) bf16
    b_f = refs[pos]; pos += 1                       # fwd bias (1, 4H) f32
    wih_b = refs[pos:pos + n]; pos += n             # bwd W_ih^T parts (Hp, 4H) bf16
    b_b = refs[pos]; pos += 1                       # bwd bias (1, 4H) f32
    whh_cat = refs[pos]; pos += 1                   # [Whh_f^T | Whh_b^T] (H, 8H) bf16
    out_f, out_b = refs[pos], refs[pos + 1]; pos += 2   # (rows, H) bf16
    (gxf_scr, gxb_scr, hof_scr, hob_scr,
     hf_scr, cf_scr, hb_scr, cb_scr) = refs[pos:pos + 8]

    @pl.when(pl.program_id(0) == 0)
    def _():
        for r in (hf_scr, cf_scr, hb_scr, cb_scr):
            r[...] = jnp.zeros_like(r)

    # Hoisted input-side GEMM: one big matmul per direction for the whole
    # chunk, off the serial critical path. bf16 operands, f32 accumulation.
    def chunk_input_gates(x_parts, wih_parts, bias_ref, gx_scr):
        acc = None
        for x_ref, w_ref in zip(x_parts, wih_parts):
            d = jnp.dot(x_ref[...].astype(jnp.bfloat16), w_ref[...],
                        preferred_element_type=jnp.float32)
            acc = d if acc is None else acc + d
        gx_scr[...] = acc + bias_ref[...]            # (rows, 4H) f32

    chunk_input_gates(xf_parts, wih_f, b_f, gxf_scr)
    chunk_input_gates(xb_parts, wih_b, b_b, gxb_scr)

    whh_cat_v = whh_cat[...]

    def sigmoid(x):                                  # EUP tanh instead of exp+recip
        return 0.5 * (jnp.tanh(0.5 * x) + 1.0)

    def cell(g, c_prev):                             # PyTorch gate order: i, f, g, o
        i = sigmoid(g[:, 0 * H:1 * H])
        f = sigmoid(g[:, 1 * H:2 * H])
        gg = jnp.tanh(g[:, 2 * H:3 * H])
        o = sigmoid(g[:, 3 * H:4 * H])
        c_new = f * c_prev + i * gg
        return o * jnp.tanh(c_new), c_new

    def step(t, carry):
        hf, cf, hb, cb = carry
        rf = pl.multiple_of(t * Bp, 8)               # fwd walks local time up
        rb = pl.multiple_of((tt - 1 - t) * Bp, 8)    # bwd walks local time down

        if fuse:
            # One MXU push for both directions: stack h along sublanes and use
            # the column-concatenated recurrent weight (H, 8H).
            h_stack = jnp.concatenate([hf, hb], axis=0).astype(jnp.bfloat16)
            rec = jnp.dot(h_stack, whh_cat_v, preferred_element_type=jnp.float32)
            rec_f = rec[:Bp, :4 * H]
            rec_b = rec[Bp:, 4 * H:]
        else:
            rec_f = jnp.dot(hf.astype(jnp.bfloat16), whh_cat_v[:, :4 * H],
                            preferred_element_type=jnp.float32)
            rec_b = jnp.dot(hb.astype(jnp.bfloat16), whh_cat_v[:, 4 * H:],
                            preferred_element_type=jnp.float32)

        gf = gxf_scr[pl.ds(rf, Bp), :] + rec_f
        gb = gxb_scr[pl.ds(rb, Bp), :] + rec_b
        hf, cf = cell(gf, cf)
        hb, cb = cell(gb, cb)
        hof_scr[pl.ds(rf, Bp), :] = hf
        hob_scr[pl.ds(rb, Bp), :] = hb
        return hf, cf, hb, cb

    init = (hf_scr[...], cf_scr[...], hb_scr[...], cb_scr[...])
    hf, cf, hb, cb = lax.fori_loop(0, tt, step, init, unroll=(tt <= 8))

    hf_scr[...] = hf
    cf_scr[...] = cf
    hb_scr[...] = hb
    cb_scr[...] = cb

    # Single full-block bf16 stores to the layer outputs (lane/sublane clean).
    out_f[...] = hof_scr[...].astype(out_f.dtype)
    out_b[...] = hob_scr[...].astype(out_b.dtype)


def bilstm_layer(x_parts, fwd_p, bwd_p, *, batch, time_tile):
    """x_parts: list of [T*Bp, width] bf16 arrays (row r = t*Bp + b).
    Returns (fwd_hidden, bwd_hidden), each [T*Bp, H] bf16."""
    TB = x_parts[0].shape[0]
    Bp = batch
    T = TB // Bp
    H = fwd_p["whh_t"].shape[0]
    tt = time_tile
    assert T % tt == 0, (T, tt)
    Tc = T // tt
    rows = tt * Bp
    assert rows % 8 == 0, rows                      # sublane-aligned chunk blocks
    fuse = (2 * H) <= 256                           # fused recurrent push fits the MXU

    fwd_map = lambda i: (i, 0)
    bwd_map = lambda i: (Tc - 1 - i, 0)
    const = lambda i: (0, 0)

    in_specs, args = [], []
    for xp in x_parts:                              # fwd-direction chunks
        in_specs.append(pl.BlockSpec((rows, xp.shape[1]), fwd_map))
        args.append(xp)
    for xp in x_parts:                              # bwd-direction chunks
        in_specs.append(pl.BlockSpec((rows, xp.shape[1]), bwd_map))
        args.append(xp)
    for dp in (fwd_p, bwd_p):                       # resident, single-buffered weights
        for w in dp["wih_t_parts"]:
            wb = w.astype(jnp.bfloat16)
            in_specs.append(_resident_spec(wb.shape, const))
            args.append(wb)
        in_specs.append(_resident_spec(dp["bias"].shape, const))
        args.append(dp["bias"])
    whh_cat = jnp.concatenate([fwd_p["whh_t"], bwd_p["whh_t"]],
                              axis=1).astype(jnp.bfloat16)      # (H, 8H)
    in_specs.append(_resident_spec(whh_cat.shape, const))
    args.append(whh_cat)

    scratch = [
        pltpu.VMEM((rows, 4 * H), jnp.float32),     # fwd chunk gates
        pltpu.VMEM((rows, 4 * H), jnp.float32),     # bwd chunk gates
        pltpu.VMEM((rows, H), jnp.float32),         # fwd chunk hidden staging
        pltpu.VMEM((rows, H), jnp.float32),         # bwd chunk hidden staging
        pltpu.VMEM((Bp, H), jnp.float32),           # hf
        pltpu.VMEM((Bp, H), jnp.float32),           # cf
        pltpu.VMEM((Bp, H), jnp.float32),           # hb
        pltpu.VMEM((Bp, H), jnp.float32),           # cb
    ]

    kernel = functools.partial(_bilstm_chunk_kernel, num_parts=len(x_parts),
                               hidden=H, tt=tt, batch=Bp, fuse=fuse)
    return pl.pallas_call(
        kernel,
        out_shape=(jax.ShapeDtypeStruct((TB, H), jnp.bfloat16),
                   jax.ShapeDtypeStruct((TB, H), jnp.bfloat16)),
        grid_spec=pltpu.PrefetchScalarGridSpec(
            num_scalar_prefetch=0,
            grid=(Tc,),
            in_specs=in_specs,
            out_specs=[pl.BlockSpec((rows, H), fwd_map),
                       pl.BlockSpec((rows, H), bwd_map)],
            scratch_shapes=scratch),
        compiler_params=pltpu.CompilerParams(
            dimension_semantics=("arbitrary",),
            vmem_limit_bytes=_VMEM_LIMIT),
    )(*args)


# ----------------------------------------------------------------------------
# Final linear + log_softmax kernel (row-tiled, 128-lane-padded output).
# Consumes the fwd/bwd hidden parts separately -> no HBM concat.
# ----------------------------------------------------------------------------
def _fc_logsoftmax_kernel(xf_ref, xb_ref, wf_ref, wb_ref, b_ref, o_ref):
    logits = (
        jnp.dot(xf_ref[...].astype(jnp.bfloat16), wf_ref[...],
                preferred_element_type=jnp.float32)
        + jnp.dot(xb_ref[...].astype(jnp.bfloat16), wb_ref[...],
                  preferred_element_type=jnp.float32)
        + b_ref[...]                # padded lanes carry -1e30 -> vanish in the LSE
    )
    m = jnp.max(logits, axis=-1, keepdims=True)
    lse = m + jnp.log(jnp.sum(jnp.exp(logits - m), axis=-1, keepdims=True))
    o_ref[...] = (logits - lse).astype(o_ref.dtype)


def fc_logsoftmax(xf, xb, wf_t, wb_t, b_pad, *, row_tile):
    N, H = xf.shape
    opad = wf_t.shape[1]
    return pl.pallas_call(
        _fc_logsoftmax_kernel,
        out_shape=jax.ShapeDtypeStruct((N, opad), jnp.float32),
        grid=(N // row_tile,),
        in_specs=[
            pl.BlockSpec((row_tile, H), lambda i: (i, 0)),
            pl.BlockSpec((row_tile, H), lambda i: (i, 0)),
            _resident_spec((H, opad), lambda i: (0, 0)),
            _resident_spec((H, opad), lambda i: (0, 0)),
            _resident_spec((1, opad), lambda i: (0, 0)),
        ],
        out_specs=pl.BlockSpec((row_tile, opad), lambda i: (i, 0)),
        compiler_params=pltpu.CompilerParams(
            dimension_semantics=("parallel",),
            vmem_limit_bytes=_VMEM_LIMIT),
    )(xf, xb, wf_t, wb_t, b_pad)


# ----------------------------------------------------------------------------
# Tile pickers (VMEM-budget driven, respecting the (8,128) block constraints).
# ----------------------------------------------------------------------------
def _pick_time_tile(T, Bp, in_width, H, budget_bytes=_CHUNK_VMEM_BUDGET):
    # Bytes that scale with the chunk length, per timestep, both directions:
    per_step = Bp * (
        2 * 2 * in_width * 2      # bf16 input chunks, 2 dirs, double-buffered
        + 2 * 2 * H * 2           # bf16 output chunks, 2 dirs, double-buffered
        + 2 * 4 * H * 4           # f32 gate scratch, 2 dirs
        + 2 * H * 4)              # f32 chunk hidden staging, 2 dirs
    max_tt = max(1, budget_bytes // per_step)
    cands = [tt for tt in range(1, min(T, max_tt) + 1)
             if T % tt == 0 and ((tt * Bp) % 8 == 0 or tt == T)]
    return max(cands) if cands else T


def _pick_row_tile(N, max_tile=1024):
    if N <= max_tile:
        return N
    best = 8
    for t in range(8, max_tile + 1, 8):
        if N % t == 0:
            best = t
    return best


# ----------------------------------------------------------------------------
# Parameter init (deterministic, mirrors the PyTorch module's shapes).
# Weights kept in f32 (reference uses them); bf16 copies are made at call time.
# ----------------------------------------------------------------------------
def init_params(key, vocab, hidden, num_layers, output_size):
    keys = iter(jax.random.split(key, 8 * num_layers + 8))
    H = hidden
    scale = 1.0 / jnp.sqrt(jnp.float32(H))

    params = {"hidden": H, "output_size": output_size}
    # nn.Embedding(input_size, hidden_size): default N(0, 1)
    params["embedding"] = jax.random.normal(next(keys), (vocab, H), jnp.float32)

    lstm_layers = []
    for layer in range(num_layers):
        in_size = H if layer == 0 else 2 * H
        layer_p = {}
        for d in ("fwd", "bwd"):
            w_ih = jax.random.uniform(next(keys), (4 * H, in_size), jnp.float32, -scale, scale)
            w_hh = jax.random.uniform(next(keys), (4 * H, H), jnp.float32, -scale, scale)
            b_ih = jax.random.uniform(next(keys), (4 * H,), jnp.float32, -scale, scale)
            b_hh = jax.random.uniform(next(keys), (4 * H,), jnp.float32, -scale, scale)
            wih_t = w_ih.T                                   # [IN, 4H]
            parts = [wih_t] if layer == 0 else [wih_t[:H], wih_t[H:]]
            layer_p[d] = dict(
                wih_t_parts=parts,                           # split along the concat axis
                whh_t=w_hh.T,                                # [H, 4H]
                bias=(b_ih + b_hh).reshape(1, 4 * H),        # [1, 4H]
            )
        lstm_layers.append(layer_p)
    params["lstm"] = lstm_layers

    fc_scale = 1.0 / jnp.sqrt(jnp.float32(2 * H))
    fc_w = jax.random.uniform(next(keys), (output_size, 2 * H), jnp.float32, -fc_scale, fc_scale)
    fc_b = jax.random.uniform(next(keys), (output_size,), jnp.float32, -fc_scale, fc_scale)
    w_t = fc_w.T                                             # [2H, O]
    opad = ((output_size + 127) // 128) * 128
    params["fc_wf_t_pad"] = jnp.zeros((H, opad), jnp.float32).at[:, :output_size].set(w_t[:H])
    params["fc_wb_t_pad"] = jnp.zeros((H, opad), jnp.float32).at[:, :output_size].set(w_t[H:])
    params["fc_b_pad"] = jnp.full((1, opad), -1e30, jnp.float32).at[0, :output_size].set(fc_b)
    params["fc_w_t"] = w_t                                   # f32 copies for the reference
    params["fc_b"] = fc_b.reshape(1, output_size)
    return params


# ----------------------------------------------------------------------------
# Full forward pass (feature_type='discrete').
# ----------------------------------------------------------------------------
def lstm_asr_forward(params, tokens):
    """tokens: int32 [B, T] -> log-probs [B, T, output_size]."""
    B, T = tokens.shape
    O = params["output_size"]
    Bp = ((B + 7) // 8) * 8                                  # sublane-aligned batch

    tokens_p = jnp.zeros((Bp, T), tokens.dtype).at[:B, :].set(tokens)

    # Embedding gather straight into time-major rows [T*Bp, H]; bf16 from here on.
    x = jnp.take(params["embedding"], tokens_p.T.reshape(-1), axis=0)
    x_parts = [x.astype(jnp.bfloat16)]

    for layer_p in params["lstm"]:
        H = layer_p["fwd"]["whh_t"].shape[0]
        in_width = sum(p.shape[1] for p in x_parts)
        tt = _pick_time_tile(T, Bp, in_width, H)
        fwd, bwd = bilstm_layer(x_parts, layer_p["fwd"], layer_p["bwd"],
                                batch=Bp, time_tile=tt)
        x_parts = [fwd, bwd]                                 # no HBM concat

    N = T * Bp
    out_pad = fc_logsoftmax(
        x_parts[0], x_parts[1],
        params["fc_wf_t_pad"].astype(jnp.bfloat16),
        params["fc_wb_t_pad"].astype(jnp.bfloat16),
        params["fc_b_pad"],
        row_tile=_pick_row_tile(N))
    out = out_pad[:, :O].reshape(T, Bp, O)[:, :B]            # drop lane + batch padding
    return jnp.transpose(out, (1, 0, 2))                     # [B, T, O]


# ----------------------------------------------------------------------------
# Pure-JAX f32 reference (mirrors PyTorch semantics) for a correctness check.
# ----------------------------------------------------------------------------
def ref_forward(params, tokens):
    B, T = tokens.shape
    H = params["hidden"]
    x = jnp.take(params["embedding"], tokens, axis=0)        # [B, T, H]

    def run_dir(dir_p, xs, reverse):
        wih_t = jnp.concatenate(dir_p["wih_t_parts"], axis=0)
        whh_t, bias = dir_p["whh_t"], dir_p["bias"]
        h = jnp.zeros((B, H), jnp.float32)
        c = jnp.zeros((B, H), jnp.float32)
        order = range(T - 1, -1, -1) if reverse else range(T)
        outs = [None] * T
        for t in order:
            g = xs[:, t] @ wih_t + h @ whh_t + bias
            i = jax.nn.sigmoid(g[:, :H])
            f = jax.nn.sigmoid(g[:, H:2 * H])
            gg = jnp.tanh(g[:, 2 * H:3 * H])
            o = jax.nn.sigmoid(g[:, 3 * H:])
            c = f * c + i * gg
            h = o * jnp.tanh(c)
            outs[t] = h
        return jnp.stack(outs, axis=1)                       # [B, T, H]

    for layer_p in params["lstm"]:
        fwd = run_dir(layer_p["fwd"], x, False)
        bwd = run_dir(layer_p["bwd"], x, True)
        x = jnp.concatenate([fwd, bwd], axis=-1)
    logits = x @ params["fc_w_t"] + params["fc_b"]
    return jax.nn.log_softmax(logits, axis=-1)


if __name__ == "__main__":
    B, T = 2, 8
    vocab, hidden, num_layers, output_size = 64, 32, 2, 28

    key = jax.random.PRNGKey(0)
    pkey, tkey = jax.random.split(key)
    params = init_params(pkey, vocab, hidden, num_layers, output_size)
    tokens = jax.random.randint(tkey, (B, T), 0, vocab, dtype=jnp.int32)

    out = lstm_asr_forward(params, tokens)
    out = jax.block_until_ready(out)

    assert out.shape == (B, T, output_size), out.shape
    ref = ref_forward(params, tokens)
    max_err = float(jnp.max(jnp.abs(out - ref)))
    assert jnp.allclose(out, ref, atol=3e-2, rtol=3e-2), f"max_err={max_err}"

    print("KERNEL_OK")
</pallas_src>

<mosaic_0001>
module attributes {stable_mosaic.version = 11 : i64} {
  func.func @k(%arg0: i32, %arg1: memref<8x128xf32, #tpu.memory_space<vmem>>, %arg2: memref<8x128xf32, #tpu.memory_space<vmem>>) attributes {dimension_semantics = [#tpu.dimension_semantics<arbitrary>], iteration_bounds = array<i64: 2>, scalar_prefetch = 0 : i64, scratch_operands = 0 : i64, tpu.core_type = #tpu.core_type<tc>, window_params = [{pipeline_mode = #tpu.pipeline_mode<synchronous>, transform_indices = @transform_0, window_bounds = array<i64: 8, 128>}, {transform_indices = @transform_1, window_bounds = array<i64: 8, 128>}]} {
    %c0 = arith.constant 0 : index
    %c0_0 = arith.constant 0 : index
    %0 = vector.load %arg1[%c0, %c0_0] : memref<8x128xf32, #tpu.memory_space<vmem>>, vector<8x128xf32>
    %cst = arith.constant 2.000000e+00 : f32
    %1 = vector.broadcast %cst : f32 to vector<8x128xf32>
    %2 = arith.mulf %0, %1 : vector<8x128xf32>
    %c0_1 = arith.constant 0 : index
    %c0_2 = arith.constant 0 : index
    %3 = vector.load %arg2[%c0_1, %c0_2] : memref<8x128xf32, #tpu.memory_space<vmem>>, vector<8x128xf32>
    tpu.vector_store %arg2[%c0_1, %c0_2], %2 {strides = array<i32>} : memref<8x128xf32, #tpu.memory_space<vmem>>, vector<8x128xf32>,
    return
  }
  func.func @transform_0(%arg0: i32) -> (i32, i32) {
    %c0_i32 = arith.constant 0 : i32
    %c0_i32_0 = arith.constant 0 : i32
    %c0_i32_1 = arith.constant 0 : i32
    return %c0_i32, %c0_i32_0 : i32, i32
  }
  func.func @transform_1(%arg0: i32) -> (i32, i32) {
    %c0_i32 = arith.constant 0 : i32
    %c0_i32_0 = arith.constant 0 : i32
    return %arg0, %c0_i32 : i32, i32
  }
}

module attributes {stable_mosaic.version = 11 : i64} {
  func.func @_bilstm_chunk_kernel(%arg0: i32, %arg1: memref<64x32xbf16, #tpu.memory_space<vmem>>, %arg2: memref<64x32xbf16, #tpu.memory_space<vmem>>, %arg3: memref<32x128xbf16, #tpu.memory_space<vmem>>, %arg4: memref<1x128xf32, #tpu.memory_space<vmem>>, %arg5: memref<32x128xbf16, #tpu.memory_space<vmem>>, %arg6: memref<1x128xf32, #tpu.memory_space<vmem>>, %arg7: memref<32x256xbf16, #tpu.memory_space<vmem>>, %arg8: memref<64x32xbf16, #tpu.memory_space<vmem>>, %arg9: memref<64x32xbf16, #tpu.memory_space<vmem>>, %arg10: memref<64x128xf32, #tpu.memory_space<vmem>>, %arg11: memref<64x128xf32, #tpu.memory_space<vmem>>, %arg12: memref<64x32xf32, #tpu.memory_space<vmem>>, %arg13: memref<64x32xf32, #tpu.memory_space<vmem>>, %arg14: memref<8x32xf32, #tpu.memory_space<vmem>>, %arg15: memref<8x32xf32, #tpu.memory_space<vmem>>, %arg16: memref<8x32xf32, #tpu.memory_space<vmem>>, %arg17: memref<8x32xf32, #tpu.memory_space<vmem>>) attributes {dimension_semantics = [#tpu.dimension_semantics<arbitrary>], iteration_bounds = array<i64: 1>, scalar_prefetch = 0 : i64, scratch_operands = 8 : i64, tpu.core_type = #tpu.core_type<tc>, window_params = [{transform_indices = @transform_0, window_bounds = array<i64: 64, 32>}, {transform_indices = @transform_1, window_bounds = array<i64: 64, 32>}, {pipeline_mode = #tpu.pipeline_mode<synchronous>, transform_indices = @transform_2, window_bounds = array<i64: 32, 128>}, {pipeline_mode = #tpu.pipeline_mode<synchronous>, transform_indices = @transform_3, window_bounds = array<i64: 1, 128>}, {pipeline_mode = #tpu.pipeline_mode<synchronous>, transform_indices = @transform_4, window_bounds = array<i64: 32, 128>}, {pipeline_mode = #tpu.pipeline_mode<synchronous>, transform_indices = @transform_5, window_bounds = array<i64: 1, 128>}, {pipeline_mode = #tpu.pipeline_mode<synchronous>, transform_indices = @transform_6, window_bounds = array<i64: 32, 256>}, {transform_indices = @transform_7, window_bounds = array<i64: 64, 32>}, {transform_indices = @transform_8, window_bounds = array<i64: 64, 32>}]} {
    %c0_i32 = arith.constant 0 : i32
    %0 = arith.cmpi eq, %arg0, %c0_i32 : i32
    %1 = arith.extui %0 : i1 to i32
    %c0_i32_0 = arith.constant 0 : i32
    %2 = arith.cmpi ne, %1, %c0_i32_0 : i32
    scf.if %2 {
      %cst_252 = arith.constant 0.000000e+00 : f32
      %688 = vector.broadcast %cst_252 : f32 to vector<8x32xf32>
      %c0_253 = arith.constant 0 : index
      %c0_254 = arith.constant 0 : index
      %689 = vector.load %arg14[%c0_253, %c0_254] : memref<8x32xf32, #tpu.memory_space<vmem>>, vector<8x32xf32>
      tpu.vector_store %arg14[%c0_253, %c0_254], %688 {strides = array<i32>} : memref<8x32xf32, #tpu.memory_space<vmem>>, vector<8x32xf32>,
      %cst_255 = arith.constant 0.000000e+00 : f32
      %690 = vector.broadcast %cst_255 : f32 to vector<8x32xf32>
      %c0_256 = arith.constant 0 : index
      %c0_257 = arith.constant 0 : index
      %691 = vector.load %arg15[%c0_256, %c0_257] : memref<8x32xf32, #tpu.memory_space<vmem>>, vector<8x32xf32>
      tpu.vector_store %arg15[%c0_256, %c0_257], %690 {strides = array<i32>} : memref<8x32xf32, #tpu.memory_space<vmem>>, vector<8x32xf32>,
      %cst_258 = arith.constant 0.000000e+00 : f32
      %692 = vector.broadcast %cst_258 : f32 to vector<8x32xf32>
      %c0_259 = arith.constant 0 : index
      %c0_260 = arith.constant 0 : index
      %693 = vector.load %arg16[%c0_259, %c0_260] : memref<8x32xf32, #tpu.memory_space<vmem>>, vector<8x32xf32>
      tpu.vector_store %arg16[%c0_259, %c0_260], %692 {strides = array<i32>} : memref<8x32xf32, #tpu.memory_space<vmem>>, vector<8x32xf32>,
      %cst_261 = arith.constant 0.000000e+00 : f32
      %694 = vector.broadcast %cst_261 : f32 to vector<8x32xf32>
      %c0_262 = arith.constant 0 : index
      %c0_263 = arith.constant 0 : index
      %695 = vector.load %arg17[%c0_262, %c0_263] : memref<8x32xf32, #tpu.memory_space<vmem>>, vector<8x32xf32>
      tpu.vector_store %arg17[%c0_262, %c0_263], %694 {strides = array<i32>} : memref<8x32xf32, #tpu.memory_space<vmem>>, vector<8x32xf32>,
    } else {
    }
    %c0 = arith.constant 0 : index
    %c0_1 = arith.constant 0 : index
    %3 = vector.load %arg1[%c0, %c0_1] : memref<64x32xbf16, #tpu.memory_space<vmem>>, vector<64x32xbf16>
    %c0_2 = arith.constant 0 : index
    %c0_3 = arith.constant 0 : index
    %4 = vector.load %arg3[%c0_2, %c0_3] : memref<32x128xbf16, #tpu.memory_space<vmem>>, vector<32x128xbf16>
    %cst = arith.constant dense<0.000000e+00> : vector<64x128xf32>
    %5 = tpu.matmul %3, %4, %cst {dimension_numbers = #tpu.dot_dimension_numbers<[1], [0], [0], [1], [0, 0, 1, 1], [], []>} : vector<64x32xbf16>, vector<32x128xbf16>, vector<64x128xf32> -> vector<64x128xf32>
    %c0_4 = arith.constant 0 : index
    %c0_5 = arith.constant 0 : index
    %6 = vector.load %arg4[%c0_4, %c0_5] : memref<1x128xf32, #tpu.memory_space<vmem>>, vector<1x128xf32>
    %7 = vector.broadcast %6 : vector<1x128xf32> to vector<64x128xf32>
    %8 = arith.addf %5, %7 : vector<64x128xf32>
    %c0_6 = arith.constant 0 : index
    %c0_7 = arith.constant 0 : index
    %9 = vector.load %arg10[%c0_6, %c0_7] : memref<64x128xf32, #tpu.memory_space<vmem>>, vector<64x128xf32>
    tpu.vector_store %arg10[%c0_6, %c0_7], %8 {strides = array<i32>} : memref<64x128xf32, #tpu.memory_space<vmem>>, vector<64x128xf32>,
    %c0_8 = arith.constant 0 : index
    %c0_9 = arith.constant 0 : index
    %10 = vector.load %arg2[%c0_8, %c0_9] : memref<64x32xbf16, #tpu.memory_space<vmem>>, vector<64x32xbf16>
    %c0_10 = arith.constant 0 : index
    %c0_11 = arith.constant 0 : index
    %11 = vector.load %arg5[%c0_10, %c0_11] : memref<32x128xbf16, #tpu.memory_space<vmem>>, vector<32x128xbf16>
    %cst_12 = arith.constant dense<0.000000e+00> : vector<64x128xf32>
    %12 = tpu.matmul %10, %11, %cst_12 {dimension_numbers = #tpu.dot_dimension_numbers<[1], [0], [0], [1], [0, 0, 1, 1], [], []>} : vector<64x32xbf16>, vector<32x128xbf16>, vector<64x128xf32> -> vector<64x128xf32>
    %c0_13 = arith.constant 0 : index
    %c0_14 = arith.constant 0 : index
    %13 = vector.load %arg6[%c0_13, %c0_14] : memref<1x128xf32, #tpu.memory_space<vmem>>, vector<1x128xf32>
    %14 = vector.broadcast %13 : vector<1x128xf32> to vector<64x128xf32>
    %15 = arith.addf %12, %14 : vector<64x128xf32>
    %c0_15 = arith.constant 0 : index
    %c0_16 = arith.constant 0 : index
    %16 = vector.load %arg11[%c0_15, %c0_16] : memref<64x128xf32, #tpu.memory_space<vmem>>, vector<64x128xf32>
    tpu.vector_store %arg11[%c0_15, %c0_16], %15 {strides = array<i32>} : memref<64x128xf32, #tpu.memory_space<vmem>>, vector<64x128xf32>,
    %c0_17 = arith.constant 0 : index
    %c0_18 = arith.constant 0 : index
    %17 = vector.load %arg7[%c0_17, %c0_18] : memref<32x256xbf16, #tpu.memory_space<vmem>>, vector<32x256xbf16>
    %c0_19 = arith.constant 0 : index
    %c0_20 = arith.constant 0 : index
    %18 = vector.load %arg14[%c0_19, %c0_20] : memref<8x32xf32, #tpu.memory_space<vmem>>, vector<8x32xf32>
    %c0_21 = arith.constant 0 : index
    %c0_22 = arith.constant 0 : index
    %19 = vector.load %arg15[%c0_21, %c0_22] : memref<8x32xf32, #tpu.memory_space<vmem>>, vector<8x32xf32>
    %c0_23 = arith.constant 0 : index
    %c0_24 = arith.constant 0 : index
    %20 = vector.load %arg16[%c0_23, %c0_24] : memref<8x32xf32, #tpu.memory_space<vmem>>, vector<8x32xf32>
    %c0_25 = arith.constant 0 : index
    %c0_26 = arith.constant 0 : index
    %21 = vector.load %arg17[%c0_25, %c0_26] : memref<8x32xf32, #tpu.memory_space<vmem>>, vector<8x32xf32>
    %c0_i32_27 = arith.constant 0 : i32
    %c8_i32 = arith.constant 8 : i32
    %22 = arith.muli %c0_i32_27, %c8_i32 : i32
    %23 = tpu.assume_multiple %22, 8 : i32
    %c7_i32 = arith.constant 7 : i32
    %24 = arith.subi %c7_i32, %c0_i32_27 : i32
    %c8_i32_28 = arith.constant 8 : i32
    %25 = arith.muli %24, %c8_i32_28 : i32
    %26 = tpu.assume_multiple %25, 8 : i32
    %27 = tpu.concatenate %18, %20 in 0 : vector<8x32xf32>, vector<8x32xf32> -> vector<16x32xf32>
    %28 = arith.truncf %27 : vector<16x32xf32> to vector<16x32xbf16>
    %cst_29 = arith.constant dense<0.000000e+00> : vector<16x256xf32>
    %29 = tpu.matmul %28, %17, %cst_29 {dimension_numbers = #tpu.dot_dimension_numbers<[1], [0], [0], [1], [0, 0, 1, 1], [], []>} : vector<16x32xbf16>, vector<32x256xbf16>, vector<16x256xf32> -> vector<16x256xf32>
    %30 = vector.extract_strided_slice %29 {offsets = [0, 0], sizes = [8, 128], strides = [1, 1]} : vector<16x256xf32> to vector<8x128xf32>
    %31 = vector.extract_strided_slice %29 {offsets = [8, 128], sizes = [8, 128], strides = [1, 1]} : vector<16x256xf32> to vector<8x128xf32>
    %32 = arith.index_cast %23 : i32 to index
    %c0_30 = arith.constant 0 : index
    %33 = vector.load %arg10[%32, %c0_30] : memref<64x128xf32, #tpu.memory_space<vmem>>, vector<8x128xf32>
    %34 = arith.addf %33, %30 : vector<8x128xf32>
    %35 = arith.index_cast %26 : i32 to index
    %c0_31 = arith.constant 0 : index
    %36 = vector.load %arg11[%35, %c0_31] : memref<64x128xf32, #tpu.memory_space<vmem>>, vector<8x128xf32>
    %37 = arith.addf %36, %31 : vector<8x128xf32>
    %38 = vector.extract_strided_slice %34 {offsets = [0, 0], sizes = [8, 32], strides = [1, 1]} : vector<8x128xf32> to vector<8x32xf32>
    %cst_32 = arith.constant 5.000000e-01 : f32
    %39 = vector.broadcast %cst_32 : f32 to vector<8x32xf32>
    %40 = arith.mulf %39, %38 : vector<8x32xf32>
    %41 = math.tanh %40 : vector<8x32xf32>
    %cst_33 = arith.constant 1.000000e+00 : f32
    %42 = vector.broadcast %cst_33 : f32 to vector<8x32xf32>
    %43 = arith.addf %41, %42 : vector<8x32xf32>
    %cst_34 = arith.constant 5.000000e-01 : f32
    %44 = vector.broadcast %cst_34 : f32 to vector<8x32xf32>
    %45 = arith.mulf %44, %43 : vector<8x32xf32>
    %46 = vector.extract_strided_slice %34 {offsets = [0, 32], sizes = [8, 32], strides = [1, 1]} : vector<8x128xf32> to vector<8x32xf32>
    %cst_35 = arith.constant 5.000000e-01 : f32
    %47 = vector.broadcast %cst_35 : f32 to vector<8x32xf32>
    %48 = arith.mulf %47, %46 : vector<8x32xf32>
    %49 = math.tanh %48 : vector<8x32xf32>
    %cst_36 = arith.constant 1.000000e+00 : f32
    %50 = vector.broadcast %cst_36 : f32 to vector<8x32xf32>
    %51 = arith.addf %49, %50 : vector<8x32xf32>
    %cst_37 = arith.constant 5.000000e-01 : f32
    %52 = vector.broadcast %cst_37 : f32 to vector<8x32xf32>
    %53 = arith.mulf %52, %51 : vector<8x32xf32>
    %54 = vector.extract_strided_slice %34 {offsets = [0, 64], sizes = [8, 32], strides = [1, 1]} : vector<8x128xf32> to vector<8x32xf32>
    %55 = math.tanh %54 : vector<8x32xf32>
    %56 = vector.extract_strided_slice %34 {offsets = [0, 96], sizes = [8, 32], strides = [1, 1]} : vector<8x128xf32> to vector<8x32xf32>
    %cst_38 = arith.constant 5.000000e-01 : f32
    %57 = vector.broadcast %cst_38 : f32 to vector<8x32xf32>
    %58 = arith.mulf %57, %56 : vector<8x32xf32>
    %59 = math.tanh %58 : vector<8x32xf32>
    %cst_39 = arith.constant 1.000000e+00 : f32
    %60 = vector.broadcast %cst_39 : f32 to vector<8x32xf32>
    %61 = arith.addf %59, %60 : vector<8x32xf32>
    %cst_40 = arith.constant 5.000000e-01 : f32
    %62 = vector.broadcast %cst_40 : f32 to vector<8x32xf32>
    %63 = arith.mulf %62, %61 : vector<8x32xf32>
    %64 = arith.mulf %53, %19 : vector<8x32xf32>
    %65 = arith.mulf %45, %55 : vector<8x32xf32>
    %66 = arith.addf %64, %65 : vector<8x32xf32>
    %67 = math.tanh %66 : vector<8x32xf32>
    %68 = arith.mulf %63, %67 : vector<8x32xf32>
    %69 = vector.extract_strided_slice %37 {offsets = [0, 0], sizes = [8, 32], strides = [1, 1]} : vector<8x128xf32> to vector<8x32xf32>
    %cst_41 = arith.constant 5.000000e-01 : f32
    %70 = vector.broadcast %cst_41 : f32 to vector<8x32xf32>
    %71 = arith.mulf %70, %69 : vector<8x32xf32>
    %72 = math.tanh %71 : vector<8x32xf32>
    %cst_42 = arith.constant 1.000000e+00 : f32
    %73 = vector.broadcast %cst_42 : f32 to vector<8x32xf32>
    %74 = arith.addf %72, %73 : vector<8x32xf32>
    %cst_43 = arith.constant 5.000000e-01 : f32
    %75 = vector.broadcast %cst_43 : f32 to vector<8x32xf32>
    %76 = arith.mulf %75, %74 : vector<8x32xf32>
    %77 = vector.extract_strided_slice %37 {offsets = [0, 32], sizes = [8, 32], strides = [1, 1]} : vector<8x128xf32> to vector<8x32xf32>
    %cst_44 = arith.constant 5.000000e-01 : f32
    %78 = vector.broadcast %cst_44 : f32 to vector<8x32xf32>
    %79 = arith.mulf %78, %77 : vector<8x32xf32>
    %80 = math.tanh %79 : vector<8x32xf32>
    %cst_45 = arith.constant 1.000000e+00 : f32
    %81 = vector.broadcast %cst_45 : f32 to vector<8x32xf32>
    %82 = arith.addf %80, %81 : vector<8x32xf32>
    %cst_46 = arith.constant 5.000000e-01 : f32
    %83 = vector.broadcast %cst_46 : f32 to vector<8x32xf32>
    %84 = arith.mulf %83, %82 : vector<8x32xf32>
    %85 = vector.extract_strided_slice %37 {offsets = [0, 64], sizes = [8, 32], strides = [1, 1]} : vector<8x128xf32> to vector<8x32xf32>
    %86 = math.tanh %85 : vector<8x32xf32>
    %87 = vector.extract_strided_slice %37 {offsets = [0, 96], sizes = [8, 32], strides = [1, 1]} : vector<8x128xf32> to vector<8x32xf32>
    %cst_47 = arith.constant 5.000000e-01 : f32
    %88 = vector.broadcast %cst_47 : f32 to vector<8x32xf32>
    %89 = arith.mulf %88, %87 : vector<8x32xf32>
    %90 = math.tanh %89 : vector<8x32xf32>
    %cst_48 = arith.constant 1.000000e+00 : f32
    %91 = vector.broadcast %cst_48 : f32 to vector<8x32xf32>
    %92 = arith.addf %90, %91 : vector<8x32xf32>
    %cst_49 = arith.constant 5.000000e-01 : f32
    %93 = vector.broadcast %cst_49 : f32 to vector<8x32xf32>
    %94 = arith.mulf %93, %92 : vector<8x32xf32>
    %95 = arith.mulf %84, %21 : vector<8x32xf32>
    %96 = arith.mulf %76, %86 : vector<8x32xf32>
    %97 = arith.addf %95, %96 : vector<8x32xf32>
    %98 = math.tanh %97 : vector<8x32xf32>
    %99 = arith.mulf %94, %98 : vector<8x32xf32>
    %100 = arith.index_cast %23 : i32 to index
    %c0_50 = arith.constant 0 : index
    %101 = vector.load %arg12[%100, %c0_50] : memref<64x32xf32, #tpu.memory_space<vmem>>, vector<8x32xf32>
    tpu.vector_store %arg12[%100, %c0_50], %68 {strides = array<i32>} : memref<64x32xf32, #tpu.memory_space<vmem>>, vector<8x32xf32>,
    %102 = arith.index_cast %26 : i32 to index
    %c0_51 = arith.constant 0 : index
    %103 = vector.load %arg13[%102, %c0_51] : memref<64x32xf32, #tpu.memory_space<vmem>>, vector<8x32xf32>
    tpu.vector_store %arg13[%102, %c0_51], %99 {strides = array<i32>} : memref<64x32xf32, #tpu.memory_space<vmem>>, vector<8x32xf32>,
    %c1_i32 = arith.constant 1 : i32
    %c8_i32_52 = arith.constant 8 : i32
    %104 = arith.muli %c1_i32, %c8_i32_52 : i32
    %105 = tpu.assume_multiple %104, 8 : i32
    %c7_i32_53 = arith.constant 7 : i32
    %106 = arith.subi %c7_i32_53, %c1_i32 : i32
    %c8_i32_54 = arith.constant 8 : i32
    %107 = arith.muli %106, %c8_i32_54 : i32
    %108 = tpu.assume_multiple %107, 8 : i32
    %109 = tpu.concatenate %68, %99 in 0 : vector<8x32xf32>, vector<8x32xf32> -> vector<16x32xf32>
    %110 = arith.truncf %109 : vector<16x32xf32> to vector<16x32xbf16>
    %cst_55 = arith.constant dense<0.000000e+00> : vector<16x256xf32>
    %111 = tpu.matmul %110, %17, %cst_55 {dimension_numbers = #tpu.dot_dimension_numbers<[1], [0], [0], [1], [0, 0, 1, 1], [], []>} : vector<16x32xbf16>, vector<32x256xbf16>, vector<16x256xf32> -> vector<16x256xf32>
    %112 = vector.extract_strided_slice %111 {offsets = [0, 0], sizes = [8, 128], strides = [1, 1]} : vector<16x256xf32> to vector<8x128xf32>
    %113 = vector.extract_strided_slice %111 {offsets = [8, 128], sizes = [8, 128], strides = [1, 1]} : vector<16x256xf32> to vector<8x128xf32>
    %114 = arith.index_cast %105 : i32 to index
    %c0_56 = arith.constant 0 : index
    %115 = vector.load %arg10[%114, %c0_56] : memref<64x128xf32, #tpu.memory_space<vmem>>, vector<8x128xf32>
    %116 = arith.addf %115, %112 : vector<8x128xf32>
    %117 = arith.index_cast %108 : i32 to index
    %c0_57 = arith.constant 0 : index
    %118 = vector.load %arg11[%117, %c0_57] : memref<64x128xf32, #tpu.memory_space<vmem>>, vector<8x128xf32>
    %119 = arith.addf %118, %113 : vector<8x128xf32>
    %120 = vector.extract_strided_slice %116 {offsets = [0, 0], sizes = [8, 32], strides = [1, 1]} : vector<8x128xf32> to vector<8x32xf32>
    %cst_58 = arith.constant 5.000000e-01 : f32
    %121 = vector.broadcast %cst_58 : f32 to vector<8x32xf32>
    %122 = arith.mulf %121, %120 : vector<8x32xf32>
    %123 = math.tanh %122 : vector<8x32xf32>
    %cst_59 = arith.constant 1.000000e+00 : f32
    %124 = vector.broadcast %cst_59 : f32 to vector<8x32xf32>
    %125 = arith.addf %123, %124 : vector<8x32xf32>
    %cst_60 = arith.constant 5.000000e-01 : f32
    %126 = vector.broadcast %cst_60 : f32 to vector<8x32xf32>
    %127 = arith.mulf %126, %125 : vector<8x32xf32>
    %128 = vector.extract_strided_slice %116 {offsets = [0, 32], sizes = [8, 32], strides = [1, 1]} : vector<8x128xf32> to vector<8x32xf32>
    %cst_61 = arith.constant 5.000000e-01 : f32
    %129 = vector.broadcast %cst_61 : f32 to vector<8x32xf32>
    %130 = arith.mulf %129, %128 : vector<8x32xf32>
    %131 = math.tanh %130 : vector<8x32xf32>
    %cst_62 = arith.constant 1.000000e+00 : f32
    %132 = vector.broadcast %cst_62 : f32 to vector<8x32xf32>
    %133 = arith.addf %131, %132 : vector<8x32xf32>
    %cst_63 = arith.constant 5.000000e-01 : f32
    %134 = vector.broadcast %cst_63 : f32 to vector<8x32xf32>
    %135 = arith.mulf %134, %133 : vector<8x32xf32>
    %136 = vector.extract_strided_slice %116 {offsets = [0, 64], sizes = [8, 32], strides = [1, 1]} : vector<8x128xf32> to vector<8x32xf32>
    %137 = math.tanh %136 : vector<8x32xf32>
    %138 = vector.extract_strided_slice %116 {offsets = [0, 96], sizes = [8, 32], strides = [1, 1]} : vector<8x128xf32> to vector<8x32xf32>
    %cst_64 = arith.constant 5.000000e-01 : f32
    %139 = vector.broadcast %cst_64 : f32 to vector<8x32xf32>
    %140 = arith.mulf %139, %138 : vector<8x32xf32>
    %141 = math.tanh %140 : vector<8x32xf32>
    %cst_65 = arith.constant 1.000000e+00 : f32
    %142 = vector.broadcast %cst_65 : f32 to vector<8x32xf32>
    %143 = arith.addf %141, %142 : vector<8x32xf32>
    %cst_66 = arith.constant 5.000000e-01 : f32
    %144 = vector.broadcast %cst_66 : f32 to vector<8x32xf32>
    %145 = arith.mulf %144, %143 : vector<8x32xf32>
    %146 = arith.mulf %135, %66 : vector<8x32xf32>
    %147 = arith.mulf %127, %137 : vector<8x32xf32>
    %148 = arith.addf %146, %147 : vector<8x32xf32>
    %149 = math.tanh %148 : vector<8x32xf32>
    %150 = arith.mulf %145, %149 : vector<8x32xf32>
    %151 = vector.extract_strided_slice %119 {offsets = [0, 0], sizes = [8, 32], strides = [1, 1]} : vector<8x128xf32> to vector<8x32xf32>
    %cst_67 = arith.constant 5.000000e-01 : f32
    %152 = vector.broadcast %cst_67 : f32 to vector<8x32xf32>
    %153 = arith.mulf %152, %151 : vector<8x32xf32>
    %154 = math.tanh %153 : vector<8x32xf32>
    %cst_68 = arith.constant 1.000000e+00 : f32
    %155 = vector.broadcast %cst_68 : f32 to vector<8x32xf32>
    %156 = arith.addf %154, %155 : vector<8x32xf32>
    %cst_69 = arith.constant 5.000000e-01 : f32
    %157 = vector.broadcast %cst_69 : f32 to vector<8x32xf32>
    %158 = arith.mulf %157, %156 : vector<8x32xf32>
    %159 = vector.extract_strided_slice %119 {offsets = [0, 32], sizes = [8, 32], strides = [1, 1]} : vector<8x128xf32> to vector<8x32xf32>
    %cst_70 = arith.constant 5.000000e-01 : f32
    %160 = vector.broadcast %cst_70 : f32 to vector<8x32xf32>
    %161 = arith.mulf %160, %159 : vector<8x32xf32>
    %162 = math.tanh %161 : vector<8x32xf32>
    %cst_71 = arith.constant 1.000000e+00 : f32
    %163 = vector.broadcast %cst_71 : f32 to vector<8x32xf32>
    %164 = arith.addf %162, %163 : vector<8x32xf32>
    %cst_72 = arith.constant 5.000000e-01 : f32
    %165 = vector.broadcast %cst_72 : f32 to vector<8x32xf32>
    %166 = arith.mulf %165, %164 : vector<8x32xf32>
    %167 = vector.extract_strided_slice %119 {offsets = [0, 64], sizes = [8, 32], strides = [1, 1]} : vector<8x128xf32> to vector<8x32xf32>
    %168 = math.tanh %167 : vector<8x32xf32>
    %169 = vector.extract_strided_slice %119 {offsets = [0, 96], sizes = [8, 32], strides = [1, 1]} : vector<8x128xf32> to vector<8x32xf32>
    %cst_73 = arith.constant 5.000000e-01 : f32
    %170 = vector.broadcast %cst_73 : f32 to vector<8x32xf32>
    %171 = arith.mulf %170, %169 : vector<8x32xf32>
    %172 = math.tanh %171 : vector<8x32xf32>
    %cst_74 = arith.constant 1.000000e+00 : f32
    %173 = vector.broadcast %cst_74 : f32 to vector<8x32xf32>
    %174 = arith.addf %172, %173 : vector<8x32xf32>
    %cst_75 = arith.constant 5.000000e-01 : f32
    %175 = vector.broadcast %cst_75 : f32 to vector<8x32xf32>
    %176 = arith.mulf %175, %174 : vector<8x32xf32>
    %177 = arith.mulf %166, %97 : vector<8x32xf32>
    %178 = arith.mulf %158, %168 : vector<8x32xf32>
    %179 = arith.addf %177, %178 : vector<8x32xf32>
    %180 = math.tanh %179 : vector<8x32xf32>
    %181 = arith.mulf %176, %180 : vector<8x32xf32>
    %182 = arith.index_cast %105 : i32 to index
    %c0_76 = arith.constant 0 : index
    %183 = vector.load %arg12[%182, %c0_76] : memref<64x32xf32, #tpu.memory_space<vmem>>, vector<8x32xf32>
    tpu.vector_store %arg12[%182, %c0_76], %150 {strides = array<i32>} : memref<64x32xf32, #tpu.memory_space<vmem>>, vector<8x32xf32>,
    %184 = arith.index_cast %108 : i32 to index
    %c0_77 = arith.constant 0 : index
    %185 = vector.load %arg13[%184, %c0_77] : memref<64x32xf32, #tpu.memory_space<vmem>>, vector<8x32xf32>
    tpu.vector_store %arg13[%184, %c0_77], %181 {strides = array<i32>} : memref<64x32xf32, #tpu.memory_space<vmem>>, vector<8x32xf32>,
    %c2_i32 = arith.constant 2 : i32
    %c8_i32_78 = arith.constant 8 : i32
    %186 = arith.muli %c2_i32, %c8_i32_78 : i32
    %187 = tpu.assume_multiple %186, 8 : i32
    %c7_i32_79 = arith.constant 7 : i32
    %188 = arith.subi %c7_i32_79, %c2_i32 : i32
    %c8_i32_80 = arith.constant 8 : i32
    %189 = arith.muli %188, %c8_i32_80 : i32
    %190 = tpu.assume_multiple %189, 8 : i32
    %191 = tpu.concatenate %150, %181 in 0 : vector<8x32xf32>, vector<8x32xf32> -> vector<16x32xf32>
    %192 = arith.truncf %191 : vector<16x32xf32> to vector<16x32xbf16>
    %cst_81 = arith.constant dense<0.000000e+00> : vector<16x256xf32>
    %193 = tpu.matmul %192, %17, %cst_81 {dimension_numbers = #tpu.dot_dimension_numbers<[1], [0], [0], [1], [0, 0, 1, 1], [], []>} : vector<16x32xbf16>, vector<32x256xbf16>, vector<16x256xf32> -> vector<16x256xf32>
    %194 = vector.extract_strided_slice %193 {offsets = [0, 0], sizes = [8, 128], strides = [1, 1]} : vector<16x256xf32> to vector<8x128xf32>
    %195 = vector.extract_strided_slice %193 {offsets = [8, 128], sizes = [8, 128], strides = [1, 1]} : vector<16x256xf32> to vector<8x128xf32>
    %196 = arith.index_cast %187 : i32 to index
    %c0_82 = arith.constant 0 : index
    %197 = vector.load %arg10[%196, %c0_82] : memref<64x128xf32, #tpu.memory_space<vmem>>, vector<8x128xf32>
    %198 = arith.addf %197, %194 : vector<8x128xf32>
    %199 = arith.index_cast %190 : i32 to index
    %c0_83 = arith.constant 0 : index
    %200 = vector.load %arg11[%199, %c0_83] : memref<64x128xf32, #tpu.memory_space<vmem>>, vector<8x128xf32>
    %201 = arith.addf %200, %195 : vector<8x128xf32>
    %202 = vector.extract_strided_slice %198 {offsets = [0, 0], sizes = [8, 32], strides = [1, 1]} : vector<8x128xf32> to vector<8x32xf32>
    %cst_84 = arith.constant 5.000000e-01 : f32
    %203 = vector.broadcast %cst_84 : f32 to vector<8x32xf32>
    %204 = arith.mulf %203, %202 : vector<8x32xf32>
    %205 = math.tanh %204 : vector<8x32xf32>
    %cst_85 = arith.constant 1.000000e+00 : f32
    %206 = vector.broadcast %cst_85 : f32 to vector<8x32xf32>
    %207 = arith.addf %205, %206 : vector<8x32xf32>
    %cst_86 = arith.constant 5.000000e-01 : f32
    %208 = vector.broadcast %cst_86 : f32 to vector<8x32xf32>
    %209 = arith.mulf %208, %207 : vector<8x32xf32>
    %210 = vector.extract_strided_slice %198 {offsets = [0, 32], sizes = [8, 32], strides = [1, 1]} : vector<8x128xf32> to vector<8x32xf32>
    %cst_87 = arith.constant 5.000000e-01 : f32
    %211 = vector.broadcast %cst_87 : f32 to vector<8x32xf32>
    %212 = arith.mulf %211, %210 : vector<8x32xf32>
    %213 = math.tanh %212 : vector<8x32xf32>
    %cst_88 = arith.constant 1.000000e+00 : f32
    %214 = vector.broadcast %cst_88 : f32 to vector<8x32xf32>
    %215 = arith.addf %213, %214 : vector<8x32xf32>
    %cst_89 = arith.constant 5.000000e-01 : f32
    %216 = vector.broadcast %cst_89 : f32 to vector<8x32xf32>
    %217 = arith.mulf %216, %215 : vector<8x32xf32>
    %218 = vector.extract_strided_slice %198 {offsets = [0, 64], sizes = [8, 32], strides = [1, 1]} : vector<8x128xf32> to vector<8x32xf32>
    %219 = math.tanh %218 : vector<8x32xf32>
    %220 = vector.extract_strided_slice %198 {offsets = [0, 96], sizes = [8, 32], strides = [1, 1]} : vector<8x128xf32> to vector<8x32xf32>
    %cst_90 = arith.constant 5.000000e-01 : f32
    %221 = vector.broadcast %cst_90 : f32 to vector<8x32xf32>
    %222 = arith.mulf %221, %220 : vector<8x32xf32>
    %223 = math.tanh %222 : vector<8x32xf32>
    %cst_91 = arith.constant 1.000000e+00 : f32
    %224 = vector.broadcast %cst_91 : f32 to vector<8x32xf32>
    %225 = arith.addf %223, %224 : vector<8x32xf32>
    %cst_92 = arith.constant 5.000000e-01 : f32
    %226 = vector.broadcast %cst_92 : f32 to vector<8x32xf32>
    %227 = arith.mulf %226, %225 : vector<8x32xf32>
    %228 = arith.mulf %217, %148 : vector<8x32xf32>
    %229 = arith.mulf %209, %219 : vector<8x32xf32>
    %230 = arith.addf %228, %229 : vector<8x32xf32>
    %231 = math.tanh %230 : vector<8x32xf32>
    %232 = arith.mulf %227, %231 : vector<8x32xf32>
    %233 = vector.extract_strided_slice %201 {offsets = [0, 0], sizes = [8, 32], strides = [1, 1]} : vector<8x128xf32> to vector<8x32xf32>
    %cst_93 = arith.constant 5.000000e-01 : f32
    %234 = vector.broadcast %cst_93 : f32 to vector<8x32xf32>
    %235 = arith.mulf %234, %233 : vector<8x32xf32>
    %236 = math.tanh %235 : vector<8x32xf32>
    %cst_94 = arith.constant 1.000000e+00 : f32
    %237 = vector.broadcast %cst_94 : f32 to vector<8x32xf32>
    %238 = arith.addf %236, %237 : vector<8x32xf32>
    %cst_95 = arith.constant 5.000000e-01 : f32
    %239 = vector.broadcast %cst_95 : f32 to vector<8x32xf32>
    %240 = arith.mulf %239, %238 : vector<8x32xf32>
    %241 = vector.extract_strided_slice %201 {offsets = [0, 32], sizes = [8, 32], strides = [1, 1]} : vector<8x128xf32> to vector<8x32xf32>
    %cst_96 = arith.constant 5.000000e-01 : f32
    %242 = vector.broadcast %cst_96 : f32 to vector<8x32xf32>
    %243 = arith.mulf %242, %241 : vector<8x32xf32>
    %244 = math.tanh %243 : vector<8x32xf32>
    %cst_97 = arith.constant 1.000000e+00 : f32
    %245 = vector.broadcast %cst_97 : f32 to vector<8x32xf32>
    %246 = arith.addf %244, %245 : vector<8x32xf32>
    %cst_98 = arith.constant 5.000000e-01 : f32
    %247 = vector.broadcast %cst_98 : f32 to vector<8x32xf32>
    %248 = arith.mulf %247, %246 : vector<8x32xf32>
    %249 = vector.extract_strided_slice %201 {offsets = [0, 64], sizes = [8, 32], strides = [1, 1]} : vector<8x128xf32> to vector<8x32xf32>
    %250 = math.tanh %249 : vector<8x32xf32>
    %251 = vector.extract_strided_slice %201 {offsets = [0, 96], sizes = [8, 32], strides = [1, 1]} : vector<8x128xf32> to vector<8x32xf32>
    %cst_99 = arith.constant 5.000000e-01 : f32
    %252 = vector.broadcast %cst_99 : f32 to vector<8x32xf32>
    %253 = arith.mulf %252, %251 : vector<8x32xf32>
    %254 = math.tanh %253 : vector<8x32xf32>
    %cst_100 = arith.constant 1.000000e+00 : f32
    %255 = vector.broadcast %cst_100 : f32 to vector<8x32xf32>
    %256 = arith.addf %254, %255 : vector<8x32xf32>
    %cst_101 = arith.constant 5.000000e-01 : f32
    %257 = vector.broadcast %cst_101 : f32 to vector<8x32xf32>
    %258 = arith.mulf %257, %256 : vector<8x32xf32>
    %259 = arith.mulf %248, %179 : vector<8x32xf32>
    %260 = arith.mulf %240, %250 : vector<8x32xf32>
    %261 = arith.addf %259, %260 : vector<8x32xf32>
    %262 = math.tanh %261 : vector<8x32xf32>
    %263 = arith.mulf %258, %262 : vector<8x32xf32>
    %264 = arith.index_cast %187 : i32 to index
    %c0_102 = arith.constant 0 : index
    %265 = vector.load %arg12[%264, %c0_102] : memref<64x32xf32, #tpu.memory_space<vmem>>, vector<8x32xf32>
    tpu.vector_store %arg12[%264, %c0_102], %232 {strides = array<i32>} : memref<64x32xf32, #tpu.memory_space<vmem>>, vector<8x32xf32>,
    %266 = arith.index_cast %190 : i32 to index
    %c0_103 = arith.constant 0 : index
    %267 = vector.load %arg13[%266, %c0_103] : memref<64x32xf32, #tpu.memory_space<vmem>>, vector<8x32xf32>
    tpu.vector_store %arg13[%266, %c0_103], %263 {strides = array<i32>} : memref<64x32xf32, #tpu.memory_space<vmem>>, vector<8x32xf32>,
    %c3_i32 = arith.constant 3 : i32
    %c8_i32_104 = arith.constant 8 : i32
    %268 = arith.muli %c3_i32, %c8_i32_104 : i32
    %269 = tpu.assume_multiple %268, 8 : i32
    %c7_i32_105 = arith.constant 7 : i32
    %270 = arith.subi %c7_i32_105, %c3_i32 : i32
    %c8_i32_106 = arith.constant 8 : i32
    %271 = arith.muli %270, %c8_i32_106 : i32
    %272 = tpu.assume_multiple %271, 8 : i32
    %273 = tpu.concatenate %232, %263 in 0 : vector<8x32xf32>, vector<8x32xf32> -> vector<16x32xf32>
    %274 = arith.truncf %273 : vector<16x32xf32> to vector<16x32xbf16>
    %cst_107 = arith.constant dense<0.000000e+00> : vector<16x256xf32>
    %275 = tpu.matmul %274, %17, %cst_107 {dimension_numbers = #tpu.dot_dimension_numbers<[1], [0], [0], [1], [0, 0, 1, 1], [], []>} : vector<16x32xbf16>, vector<32x256xbf16>, vector<16x256xf32> -> vector<16x256xf32>
    %276 = vector.extract_strided_slice %275 {offsets = [0, 0], sizes = [8, 128], strides = [1, 1]} : vector<16x256xf32> to vector<8x128xf32>
    %277 = vector.extract_strided_slice %275 {offsets = [8, 128], sizes = [8, 128], strides = [1, 1]} : vector<16x256xf32> to vector<8x128xf32>
    %278 = arith.index_cast %269 : i32 to index
    %c0_108 = arith.constant 0 : index
    %279 = vector.load %arg10[%278, %c0_108] : memref<64x128xf32, #tpu.memory_space<vmem>>, vector<8x128xf32>
    %280 = arith.addf %279, %276 : vector<8x128xf32>
    %281 = arith.index_cast %272 : i32 to index
    %c0_109 = arith.constant 0 : index
    %282 = vector.load %arg11[%281, %c0_109] : memref<64x128xf32, #tpu.memory_space<vmem>>, vector<8x128xf32>
    %283 = arith.addf %282, %277 : vector<8x128xf32>
    %284 = vector.extract_strided_slice %280 {offsets = [0, 0], sizes = [8, 32], strides = [1, 1]} : vector<8x128xf32> to vector<8x32xf32>
    %cst_110 = arith.constant 5.000000e-01 : f32
    %285 = vector.broadcast %cst_110 : f32 to vector<8x32xf32>
    %286 = arith.mulf %285, %284 : vector<8x32xf32>
    %287 = math.tanh %286 : vector<8x32xf32>
    %cst_111 = arith.constant 1.000000e+00 : f32
    %288 = vector.broadcast %cst_111 : f32 to vector<8x32xf32>
    %289 = arith.addf %287, %288 : vector<8x32xf32>
    %cst_112 = arith.constant 5.000000e-01 : f32
    %290 = vector.broadcast %cst_112 : f32 to vector<8x32xf32>
    %291 = arith.mulf %290, %289 : vector<8x32xf32>
    %292 = vector.extract_strided_slice %280 {offsets = [0, 32], sizes = [8, 32], strides = [1, 1]} : vector<8x128xf32> to vector<8x32xf32>
    %cst_113 = arith.constant 5.000000e-01 : f32
    %293 = vector.broadcast %cst_113 : f32 to vector<8x32xf32>
    %294 = arith.mulf %293, %292 : vector<8x32xf32>
    %295 = math.tanh %294 : vector<8x32xf32>
    %cst_114 = arith.constant 1.000000e+00 : f32
    %296 = vector.broadcast %cst_114 : f32 to vector<8x32xf32>
    %297 = arith.addf %295, %296 : vector<8x32xf32>
    %cst_115 = arith.constant 5.000000e-01 : f32
    %298 = vector.broadcast %cst_115 : f32 to vector<8x32xf32>
    %299 = arith.mulf %298, %297 : vector<8x32xf32>
    %300 = vector.extract_strided_slice %280 {offsets = [0, 64], sizes = [8, 32], strides = [1, 1]} : vector<8x128xf32> to vector<8x32xf32>
    %301 = math.tanh %300 : vector<8x32xf32>
    %302 = vector.extract_strided_slice %280 {offsets = [0, 96], sizes = [8, 32], strides = [1, 1]} : vector<8x128xf32> to vector<8x32xf32>
    %cst_116 = arith.constant 5.000000e-01 : f32
    %303 = vector.broadcast %cst_116 : f32 to vector<8x32xf32>
    %304 = arith.mulf %303, %302 : vector<8x32xf32>
    %305 = math.tanh %304 : vector<8x32xf32>
    %cst_117 = arith.constant 1.000000e+00 : f32
    %306 = vector.broadcast %cst_117 : f32 to vector<8x32xf32>
    %307 = arith.addf %305, %306 : vector<8x32xf32>
    %cst_118 = arith.constant 5.000000e-01 : f32
    %308 = vector.broadcast %cst_118 : f32 to vector<8x32xf32>
    %309 = arith.mulf %308, %307 : vector<8x32xf32>
    %310 = arith.mulf %299, %230 : vector<8x32xf32>
    %311 = arith.mulf %291, %301 : vector<8x32xf32>
    %312 = arith.addf %310, %311 : vector<8x32xf32>
    %313 = math.tanh %312 : vector<8x32xf32>
    %314 = arith.mulf %309, %313 : vector<8x32xf32>
    %315 = vector.extract_strided_slice %283 {offsets = [0, 0], sizes = [8, 32], strides = [1, 1]} : vector<8x128xf32> to vector<8x32xf32>
    %cst_119 = arith.constant 5.000000e-01 : f32
    %316 = vector.broadcast %cst_119 : f32 to vector<8x32xf32>
    %317 = arith.mulf %316, %315 : vector<8x32xf32>
    %318 = math.tanh %317 : vector<8x32xf32>
    %cst_120 = arith.constant 1.000000e+00 : f32
    %319 = vector.broadcast %cst_120 : f32 to vector<8x32xf32>
    %320 = arith.addf %318, %319 : vector<8x32xf32>
    %cst_121 = arith.constant 5.000000e-01 : f32
    %321 = vector.broadcast %cst_121 : f32 to vector<8x32xf32>
    %322 = arith.mulf %321, %320 : vector<8x32xf32>
    %323 = vector.extract_strided_slice %283 {offsets = [0, 32], sizes = [8, 32], strides = [1, 1]} : vector<8x128xf32> to vector<8x32xf32>
    %cst_122 = arith.constant 5.000000e-01 : f32
    %324 = vector.broadcast %cst_122 : f32 to vector<8x32xf32>
    %325 = arith.mulf %324, %323 : vector<8x32xf32>
    %326 = math.tanh %325 : vector<8x32xf32>
    %cst_123 = arith.constant 1.000000e+00 : f32
    %327 = vector.broadcast %cst_123 : f32 to vector<8x32xf32>
    %328 = arith.addf %326, %327 : vector<8x32xf32>
    %cst_124 = arith.constant 5.000000e-01 : f32
    %329 = vector.broadcast %cst_124 : f32 to vector<8x32xf32>
    %330 = arith.mulf %329, %328 : vector<8x32xf32>
    %331 = vector.extract_strided_slice %283 {offsets = [0, 64], sizes = [8, 32], strides = [1, 1]} : vector<8x128xf32> to vector<8x32xf32>
    %332 = math.tanh %331 : vector<8x32xf32>
    %333 = vector.extract_strided_slice %283 {offsets = [0, 96], sizes = [8, 32], strides = [1, 1]} : vector<8x128xf32> to vector<8x32xf32>
    %cst_125 = arith.constant 5.000000e-01 : f32
    %334 = vector.broadcast %cst_125 : f32 to vector<8x32xf32>
    %335 = arith.mulf %334, %333 : vector<8x32xf32>
    %336 = math.tanh %335 : vector<8x32xf32>
    %cst_126 = arith.constant 1.000000e+00 : f32
    %337 = vector.broadcast %cst_126 : f32 to vector<8x32xf32>
    %338 = arith.addf %336, %337 : vector<8x32xf32>
    %cst_127 = arith.constant 5.000000e-01 : f32
    %339 = vector.broadcast %cst_127 : f32 to vector<8x32xf32>
    %340 = arith.mulf %339, %338 : vector<8x32xf32>
    %341 = arith.mulf %330, %261 : vector<8x32xf32>
    %342 = arith.mulf %322, %332 : vector<8x32xf32>
    %343 = arith.addf %341, %342 : vector<8x32xf32>
    %344 = math.tanh %343 : vector<8x32xf32>
    %345 = arith.mulf %340, %344 : vector<8x32xf32>
    %346 = arith.index_cast %269 : i32 to index
    %c0_128 = arith.constant 0 : index
    %347 = vector.load %arg12[%346, %c0_128] : memref<64x32xf32, #tpu.memory_space<vmem>>, vector<8x32xf32>
    tpu.vector_store %arg12[%346, %c0_128], %314 {strides = array<i32>} : memref<64x32xf32, #tpu.memory_space<vmem>>, vector<8x32xf32>,
    %348 = arith.index_cast %272 : i32 to index
    %c0_129 = arith.constant 0 : index
    %349 = vector.load %arg13[%348, %c0_129] : memref<64x32xf32, #tpu.memory_space<vmem>>, vector<8x32xf32>
    tpu.vector_store %arg13[%348, %c0_129], %345 {strides = array<i32>} : memref<64x32xf32, #tpu.memory_space<vmem>>, vector<8x32xf32>,
    %c4_i32 = arith.constant 4 : i32
    %c8_i32_130 = arith.constant 8 : i32
    %350 = arith.muli %c4_i32, %c8_i32_130 : i32
    %351 = tpu.assume_multiple %350, 8 : i32
    %c7_i32_131 = arith.constant 7 : i32
    %352 = arith.subi %c7_i32_131, %c4_i32 : i32
    %c8_i32_132 = arith.constant 8 : i32
    %353 = arith.muli %352, %c8_i32_132 : i32
    %354 = tpu.assume_multiple %353, 8 : i32
    %355 = tpu.concatenate %314, %345 in 0 : vector<8x32xf32>, vector<8x32xf32> -> vector<16x32xf32>
    %356 = arith.truncf %355 : vector<16x32xf32> to vector<16x32xbf16>
    %cst_133 = arith.constant dense<0.000000e+00> : vector<16x256xf32>
    %357 = tpu.matmul %356, %17, %cst_133 {dimension_numbers = #tpu.dot_dimension_numbers<[1], [0], [0], [1], [0, 0, 1, 1], [], []>} : vector<16x32xbf16>, vector<32x256xbf16>, vector<16x256xf32> -> vector<16x256xf32>
    %358 = vector.extract_strided_slice %357 {offsets = [0, 0], sizes = [8, 128], strides = [1, 1]} : vector<16x256xf32> to vector<8x128xf32>
    %359 = vector.extract_strided_slice %357 {offsets = [8, 128], sizes = [8, 128], strides = [1, 1]} : vector<16x256xf32> to vector<8x128xf32>
    %360 = arith.index_cast %351 : i32 to index
    %c0_134 = arith.constant 0 : index
    %361 = vector.load %arg10[%360, %c0_134] : memref<64x128xf32, #tpu.memory_space<vmem>>, vector<8x128xf32>
    %362 = arith.addf %361, %358 : vector<8x128xf32>
    %363 = arith.index_cast %354 : i32 to index
    %c0_135 = arith.constant 0 : index
    %364 = vector.load %arg11[%363, %c0_135] : memref<64x128xf32, #tpu.memory_space<vmem>>, vector<8x128xf32>
    %365 = arith.addf %364, %359 : vector<8x128xf32>
    %366 = vector.extract_strided_slice %362 {offsets = [0, 0], sizes = [8, 32], strides = [1, 1]} : vector<8x128xf32> to vector<8x32xf32>
    %cst_136 = arith.constant 5.000000e-01 : f32
    %367 = vector.broadcast %cst_136 : f32 to vector<8x32xf32>
    %368 = arith.mulf %367, %366 : vector<8x32xf32>
    %369 = math.tanh %368 : vector<8x32xf32>
    %cst_137 = arith.constant 1.000000e+00 : f32
    %370 = vector.broadcast %cst_137 : f32 to vector<8x32xf32>
    %371 = arith.addf %369, %370 : vector<8x32xf32>
    %cst_138 = arith.constant 5.000000e-01 : f32
    %372 = vector.broadcast %cst_138 : f32 to vector<8x32xf32>
    %373 = arith.mulf %372, %371 : vector<8x32xf32>
    %374 = vector.extract_strided_slice %362 {offsets = [0, 32], sizes = [8, 32], strides = [1, 1]} : vector<8x128xf32> to vector<8x32xf32>
    %cst_139 = arith.constant 5.000000e-01 : f32
    %375 = vector.broadcast %cst_139 : f32 to vector<8x32xf32>
    %376 = arith.mulf %375, %374 : vector<8x32xf32>
    %377 = math.tanh %376 : vector<8x32xf32>
    %cst_140 = arith.constant 1.000000e+00 : f32
    %378 = vector.broadcast %cst_140 : f32 to vector<8x32xf32>
    %379 = arith.addf %377, %378 : vector<8x32xf32>
    %cst_141 = arith.constant 5.000000e-01 : f32
    %380 = vector.broadcast %cst_141 : f32 to vector<8x32xf32>
    %381 = arith.mulf %380, %379 : vector<8x32xf32>
    %382 = vector.extract_strided_slice %362 {offsets = [0, 64], sizes = [8, 32], strides = [1, 1]} : vector<8x128xf32> to vector<8x32xf32>
    %383 = math.tanh %382 : vector<8x32xf32>
    %384 = vector.extract_strided_slice %362 {offsets = [0, 96], sizes = [8, 32], strides = [1, 1]} : vector<8x128xf32> to vector<8x32xf32>
    %cst_142 = arith.constant 5.000000e-01 : f32
    %385 = vector.broadcast %cst_142 : f32 to vector<8x32xf32>
    %386 = arith.mulf %385, %384 : vector<8x32xf32>
    %387 = math.tanh %386 : vector<8x32xf32>
    %cst_143 = arith.constant 1.000000e+00 : f32
    %388 = vector.broadcast %cst_143 : f32 to vector<8x32xf32>
    %389 = arith.addf %387, %388 : vector<8x32xf32>
    %cst_144 = arith.constant 5.000000e-01 : f32
    %390 = vector.broadcast %cst_144 : f32 to vector<8x32xf32>
    %391 = arith.mulf %390, %389 : vector<8x32xf32>
    %392 = arith.mulf %381, %312 : vector<8x32xf32>
    %393 = arith.mulf %373, %383 : vector<8x32xf32>
    %394 = arith.addf %392, %393 : vector<8x32xf32>
    %395 = math.tanh %394 : vector<8x32xf32>
    %396 = arith.mulf %391, %395 : vector<8x32xf32>
    %397 = vector.extract_strided_slice %365 {offsets = [0, 0], sizes = [8, 32], strides = [1, 1]} : vector<8x128xf32> to vector<8x32xf32>
    %cst_145 = arith.constant 5.000000e-01 : f32
    %398 = vector.broadcast %cst_145 : f32 to vector<8x32xf32>
    %399 = arith.mulf %398, %397 : vector<8x32xf32>
    %400 = math.tanh %399 : vector<8x32xf32>
    %cst_146 = arith.constant 1.000000e+00 : f32
    %401 = vector.broadcast %cst_146 : f32 to vector<8x32xf32>
    %402 = arith.addf %400, %401 : vector<8x32xf32>
    %cst_147 = arith.constant 5.000000e-01 : f32
    %403 = vector.broadcast %cst_147 : f32 to vector<8x32xf32>
    %404 = arith.mulf %403, %402 : vector<8x32xf32>
    %405 = vector.extract_strided_slice %365 {offsets = [0, 32], sizes = [8, 32], strides = [1, 1]} : vector<8x128xf32> to vector<8x32xf32>
    %cst_148 = arith.constant 5.000000e-01 : f32
    %406 = vector.broadcast %cst_148 : f32 to vector<8x32xf32>
    %407 = arith.mulf %406, %405 : vector<8x32xf32>
    %408 = math.tanh %407 : vector<8x32xf32>
    %cst_149 = arith.constant 1.000000e+00 : f32
    %409 = vector.broadcast %cst_149 : f32 to vector<8x32xf32>
    %410 = arith.addf %408, %409 : vector<8x32xf32>
    %cst_150 = arith.constant 5.000000e-01 : f32
    %411 = vector.broadcast %cst_150 : f32 to vector<8x32xf32>
    %412 = arith.mulf %411, %410 : vector<8x32xf32>
    %413 = vector.extract_strided_slice %365 {offsets = [0, 64], sizes = [8, 32], strides = [1, 1]} : vector<8x128xf32> to vector<8x32xf32>
    %414 = math.tanh %413 : vector<8x32xf32>
    %415 = vector.extract_strided_slice %365 {offsets = [0, 96], sizes = [8, 32], strides = [1, 1]} : vector<8x128xf32> to vector<8x32xf32>
    %cst_151 = arith.constant 5.000000e-01 : f32
    %416 = vector.broadcast %cst_151 : f32 to vector<8x32xf32>
    %417 = arith.mulf %416, %415 : vector<8x32xf32>
    %418 = math.tanh %417 : vector<8x32xf32>
    %cst_152 = arith.constant 1.000000e+00 : f32
    %419 = vector.broadcast %cst_152 : f32 to vector<8x32xf32>
    %420 = arith.addf %418, %419 : vector<8x32xf32>
    %cst_153 = arith.constant 5.000000e-01 : f32
    %421 = vector.broadcast %cst_153 : f32 to vector<8x32xf32>
    %422 = arith.mulf %421, %420 : vector<8x32xf32>
    %423 = arith.mulf %412, %343 : vector<8x32xf32>
    %424 = arith.mulf %404, %414 : vector<8x32xf32>
    %425 = arith.addf %423, %424 : vector<8x32xf32>
    %426 = math.tanh %425 : vector<8x32xf32>
    %427 = arith.mulf %422, %426 : vector<8x32xf32>
    %428 = arith.index_cast %351 : i32 to index
    %c0_154 = arith.constant 0 : index
    %429 = vector.load %arg12[%428, %c0_154] : memref<64x32xf32, #tpu.memory_space<vmem>>, vector<8x32xf32>
    tpu.vector_store %arg12[%428, %c0_154], %396 {strides = array<i32>} : memref<64x32xf32, #tpu.memory_space<vmem>>, vector<8x32xf32>,
    %430 = arith.index_cast %354 : i32 to index
    %c0_155 = arith.constant 0 : index
    %431 = vector.load %arg13[%430, %c0_155] : memref<64x32xf32, #tpu.memory_space<vmem>>, vector<8x32xf32>
    tpu.vector_store %arg13[%430, %c0_155], %427 {strides = array<i32>} : memref<64x32xf32, #tpu.memory_space<vmem>>, vector<8x32xf32>,
    %c5_i32 = arith.constant 5 : i32
    %c8_i32_156 = arith.constant 8 : i32
    %432 = arith.muli %c5_i32, %c8_i32_156 : i32
    %433 = tpu.assume_multiple %432, 8 : i32
    %c7_i32_157 = arith.constant 7 : i32
    %434 = arith.subi %c7_i32_157, %c5_i32 : i32
    %c8_i32_158 = arith.constant 8 : i32
    %435 = arith.muli %434, %c8_i32_158 : i32
    %436 = tpu.assume_multiple %435, 8 : i32
    %437 = tpu.concatenate %396, %427 in 0 : vector<8x32xf32>, vector<8x32xf32> -> vector<16x32xf32>
    %438 = arith.truncf %437 : vector<16x32xf32> to vector<16x32xbf16>
    %cst_159 = arith.constant dense<0.000000e+00> : vector<16x256xf32>
    %439 = tpu.matmul %438, %17, %cst_159 {dimension_numbers = #tpu.dot_dimension_numbers<[1], [0], [0], [1], [0, 0, 1, 1], [], []>} : vector<16x32xbf16>, vector<32x256xbf16>, vector<16x256xf32> -> vector<16x256xf32>
    %440 = vector.extract_strided_slice %439 {offsets = [0, 0], sizes = [8, 128], strides = [1, 1]} : vector<16x256xf32> to vector<8x128xf32>
    %441 = vector.extract_strided_slice %439 {offsets = [8, 128], sizes = [8, 128], strides = [1, 1]} : vector<16x256xf32> to vector<8x128xf32>
    %442 = arith.index_cast %433 : i32 to index
    %c0_160 = arith.constant 0 : index
    %443 = vector.load %arg10[%442, %c0_160] : memref<64x128xf32, #tpu.memory_space<vmem>>, vector<8x128xf32>
    %444 = arith.addf %443, %440 : vector<8x128xf32>
    %445 = arith.index_cast %436 : i32 to index
    %c0_161 = arith.constant 0 : index
    %446 = vector.load %arg11[%445, %c0_161] : memref<64x128xf32, #tpu.memory_space<vmem>>, vector<8x128xf32>
    %447 = arith.addf %446, %441 : vector<8x128xf32>
    %448 = vector.extract_strided_slice %444 {offsets = [0, 0], sizes = [8, 32], strides = [1, 1]} : vector<8x128xf32> to vector<8x32xf32>
    %cst_162 = arith.constant 5.000000e-01 : f32
    %449 = vector.broadcast %cst_162 : f32 to vector<8x32xf32>
    %450 = arith.mulf %449, %448 : vector<8x32xf32>
    %451 = math.tanh %450 : vector<8x32xf32>
    %cst_163 = arith.constant 1.000000e+00 : f32
    %452 = vector.broadcast %cst_163 : f32 to vector<8x32xf32>
    %453 = arith.addf %451, %452 : vector<8x32xf32>
    %cst_164 = arith.constant 5.000000e-01 : f32
    %454 = vector.broadcast %cst_164 : f32 to vector<8x32xf32>
    %455 = arith.mulf %454, %453 : vector<8x32xf32>
    %456 = vector.extract_strided_slice %444 {offsets = [0, 32], sizes = [8, 32], strides = [1, 1]} : vector<8x128xf32> to vector<8x32xf32>
    %cst_165 = arith.constant 5.000000e-01 : f32
    %457 = vector.broadcast %cst_165 : f32 to vector<8x32xf32>
    %458 = arith.mulf %457, %456 : vector<8x32xf32>
    %459 = math.tanh %458 : vector<8x32xf32>
    %cst_166 = arith.constant 1.000000e+00 : f32
    %460 = vector.broadcast %cst_166 : f32 to vector<8x32xf32>
    %461 = arith.addf %459, %460 : vector<8x32xf32>
    %cst_167 = arith.constant 5.000000e-01 : f32
    %462 = vector.broadcast %cst_167 : f32 to vector<8x32xf32>
    %463 = arith.mulf %462, %461 : vector<8x32xf32>
    %464 = vector.extract_strided_slice %444 {offsets = [0, 64], sizes = [8, 32], strides = [1, 1]} : vector<8x128xf32> to vector<8x32xf32>
    %465 = math.tanh %464 : vector<8x32xf32>
    %466 = vector.extract_strided_slice %444 {offsets = [0, 96], sizes = [8, 32], strides = [1, 1]} : vector<8x128xf32> to vector<8x32xf32>
    %cst_168 = arith.constant 5.000000e-01 : f32
    %467 = vector.broadcast %cst_168 : f32 to vector<8x32xf32>
    %468 = arith.mulf %467, %466 : vector<8x32xf32>
    %469 = math.tanh %468 : vector<8x32xf32>
    %cst_169 = arith.constant 1.000000e+00 : f32
    %470 = vector.broadcast %cst_169 : f32 to vector<8x32xf32>
    %471 = arith.addf %469, %470 : vector<8x32xf32>
    %cst_170 = arith.constant 5.000000e-01 : f32
    %472 = vector.broadcast %cst_170 : f32 to vector<8x32xf32>
    %473 = arith.mulf %472, %471 : vector<8x32xf32>
    %474 = arith.mulf %463, %394 : vector<8x32xf32>
    %475 = arith.mulf %455, %465 : vector<8x32xf32>
    %476 = arith.addf %474, %475 : vector<8x32xf32>
    %477 = math.tanh %476 : vector<8x32xf32>
    %478 = arith.mulf %473, %477 : vector<8x32xf32>
    %479 = vector.extract_strided_slice %447 {offsets = [0, 0], sizes = [8, 32], strides = [1, 1]} : vector<8x128xf32> to vector<8x32xf32>
    %cst_171 = arith.constant 5.000000e-01 : f32
    %480 = vector.broadcast %cst_171 : f32 to vector<8x32xf32>
    %481 = arith.mulf %480, %479 : vector<8x32xf32>
    %482 = math.tanh %481 : vector<8x32xf32>
    %cst_172 = arith.constant 1.000000e+00 : f32
    %483 = vector.broadcast %cst_172 : f32 to vector<8x32xf32>
    %484 = arith.addf %482, %483 : vector<8x32xf32>
    %cst_173 = arith.constant 5.000000e-01 : f32
    %485 = vector.broadcast %cst_173 : f32 to vector<8x32xf32>
    %486 = arith.mulf %485, %484 : vector<8x32xf32>
    %487 = vector.extract_strided_slice %447 {offsets = [0, 32], sizes = [8, 32], strides = [1, 1]} : vector<8x128xf32> to vector<8x32xf32>
    %cst_174 = arith.constant 5.000000e-01 : f32
    %488 = vector.broadcast %cst_174 : f32 to vector<8x32xf32>
    %489 = arith.mulf %488, %487 : vector<8x32xf32>
    %490 = math.tanh %489 : vector<8x32xf32>
    %cst_175 = arith.constant 1.000000e+00 : f32
    %491 = vector.broadcast %cst_175 : f32 to vector<8x32xf32>
    %492 = arith.addf %490, %491 : vector<8x32xf32>
    %cst_176 = arith.constant 5.000000e-01 : f32
    %493 = vector.broadcast %cst_176 : f32 to vector<8x32xf32>
    %494 = arith.mulf %493, %492 : vector<8x32xf32>
    %495 = vector.extract_strided_slice %447 {offsets = [0, 64], sizes = [8, 32], strides = [1, 1]} : vector<8x128xf32> to vector<8x32xf32>
    %496 = math.tanh %495 : vector<8x32xf32>
    %497 = vector.extract_strided_slice %447 {offsets = [0, 96], sizes = [8, 32], strides = [1, 1]} : vector<8x128xf32> to vector<8x32xf32>
    %cst_177 = arith.constant 5.000000e-01 : f32
    %498 = vector.broadcast %cst_177 : f32 to vector<8x32xf32>
    %499 = arith.mulf %498, %497 : vector<8x32xf32>
    %500 = math.tanh %499 : vector<8x32xf32>
    %cst_178 = arith.constant 1.000000e+00 : f32
    %501 = vector.broadcast %cst_178 : f32 to vector<8x32xf32>
    %502 = arith.addf %500, %501 : vector<8x32xf32>
    %cst_179 = arith.constant 5.000000e-01 : f32
    %503 = vector.broadcast %cst_179 : f32 to vector<8x32xf32>
    %504 = arith.mulf %503, %502 : vector<8x32xf32>
    %505 = arith.mulf %494, %425 : vector<8x32xf32>
    %506 = arith.mulf %486, %496 : vector<8x32xf32>
    %507 = arith.addf %505, %506 : vector<8x32xf32>
    %508 = math.tanh %507 : vector<8x32xf32>
    %509 = arith.mulf %504, %508 : vector<8x32xf32>
    %510 = arith.index_cast %433 : i32 to index
    %c0_180 = arith.constant 0 : index
    %511 = vector.load %arg12[%510, %c0_180] : memref<64x32xf32, #tpu.memory_space<vmem>>, vector<8x32xf32>
    tpu.vector_store %arg12[%510, %c0_180], %478 {strides = array<i32>} : memref<64x32xf32, #tpu.memory_space<vmem>>, vector<8x32xf32>,
    %512 = arith.index_cast %436 : i32 to index
    %c0_181 = arith.constant 0 : index
    %513 = vector.load %arg13[%512, %c0_181] : memref<64x32xf32, #tpu.memory_space<vmem>>, vector<8x32xf32>
    tpu.vector_store %arg13[%512, %c0_181], %509 {strides = array<i32>} : memref<64x32xf32, #tpu.memory_space<vmem>>, vector<8x32xf32>,
    %c6_i32 = arith.constant 6 : i32
    %c8_i32_182 = arith.constant 8 : i32
    %514 = arith.muli %c6_i32, %c8_i32_182 : i32
    %515 = tpu.assume_multiple %514, 8 : i32
    %c7_i32_183 = arith.constant 7 : i32
    %516 = arith.subi %c7_i32_183, %c6_i32 : i32
    %c8_i32_184 = arith.constant 8 : i32
    %517 = arith.muli %516, %c8_i32_184 : i32
    %518 = tpu.assume_multiple %517, 8 : i32
    %519 = tpu.concatenate %478, %509 in 0 : vector<8x32xf32>, vector<8x32xf32> -> vector<16x32xf32>
    %520 = arith.truncf %519 : vector<16x32xf32> to vector<16x32xbf16>
    %cst_185 = arith.constant dense<0.000000e+00> : vector<16x256xf32>
    %521 = tpu.matmul %520, %17, %cst_185 {dimension_numbers = #tpu.dot_dimension_numbers<[1], [0], [0], [1], [0, 0, 1, 1], [], []>} : vector<16x32xbf16>, vector<32x256xbf16>, vector<16x256xf32> -> vector<16x256xf32>
    %522 = vector.extract_strided_slice %521 {offsets = [0, 0], sizes = [8, 128], strides = [1, 1]} : vector<16x256xf32> to vector<8x128xf32>
    %523 = vector.extract_strided_slice %521 {offsets = [8, 128], sizes = [8, 128], strides = [1, 1]} : vector<16x256xf32> to vector<8x128xf32>
    %524 = arith.index_cast %515 : i32 to index
    %c0_186 = arith.constant 0 : index
    %525 = vector.load %arg10[%524, %c0_186] : memref<64x128xf32, #tpu.memory_space<vmem>>, vector<8x128xf32>
    %526 = arith.addf %525, %522 : vector<8x128xf32>
    %527 = arith.index_cast %518 : i32 to index
    %c0_187 = arith.constant 0 : index
    %528 = vector.load %arg11[%527, %c0_187] : memref<64x128xf32, #tpu.memory_space<vmem>>, vector<8x128xf32>
    %529 = arith.addf %528, %523 : vector<8x128xf32>
    %530 = vector.extract_strided_slice %526 {offsets = [0, 0], sizes = [8, 32], strides = [1, 1]} : vector<8x128xf32> to vector<8x32xf32>
    %cst_188 = arith.constant 5.000000e-01 : f32
    %531 = vector.broadcast %cst_188 : f32 to vector<8x32xf32>
    %532 = arith.mulf %531, %530 : vector<8x32xf32>
    %533 = math.tanh %532 : vector<8x32xf32>
    %cst_189 = arith.constant 1.000000e+00 : f32
    %534 = vector.broadcast %cst_189 : f32 to vector<8x32xf32>
    %535 = arith.addf %533, %534 : vector<8x32xf32>
    %cst_190 = arith.constant 5.000000e-01 : f32
    %536 = vector.broadcast %cst_190 : f32 to vector<8x32xf32>
    %537 = arith.mulf %536, %535 : vector<8x32xf32>
    %538 = vector.extract_strided_slice %526 {offsets = [0, 32], sizes = [8, 32], strides = [1, 1]} : vector<8x128xf32> to vector<8x32xf32>
    %cst_191 = arith.constant 5.000000e-01 : f32
    %539 = vector.broadcast %cst_191 : f32 to vector<8x32xf32>
    %540 = arith.mulf %539, %538 : vector<8x32xf32>
    %541 = math.tanh %540 : vector<8x32xf32>
    %cst_192 = arith.constant 1.000000e+00 : f32
    %542 = vector.broadcast %cst_192 : f32 to vector<8x32xf32>
    %543 = arith.addf %541, %542 : vector<8x32xf32>
    %cst_193 = arith.constant 5.000000e-01 : f32
    %544 = vector.broadcast %cst_193 : f32 to vector<8x32xf32>
    %545 = arith.mulf %544, %543 : vector<8x32xf32>
    %546 = vector.extract_strided_slice %526 {offsets = [0, 64], sizes = [8, 32], strides = [1, 1]} : vector<8x128xf32> to vector<8x32xf32>
    %547 = math.tanh %546 : vector<8x32xf32>
    %548 = vector.extract_strided_slice %526 {offsets = [0, 96], sizes = [8, 32], strides = [1, 1]} : vector<8x128xf32> to vector<8x32xf32>
    %cst_194 = arith.constant 5.000000e-01 : f32
    %549 = vector.broadcast %cst_194 : f32 to vector<8x32xf32>
    %550 = arith.mulf %549, %548 : vector<8x32xf32>
    %551 = math.tanh %550 : vector<8x32xf32>
    %cst_195 = arith.constant 1.000000e+00 : f32
    %552 = vector.broadcast %cst_195 : f32 to vector<8x32xf32>
    %553 = arith.addf %551, %552 : vector<8x32xf32>
    %cst_196 = arith.constant 5.000000e-01 : f32
    %554 = vector.broadcast %cst_196 : f32 to vector<8x32xf32>
    %555 = arith.mulf %554, %553 : vector<8x32xf32>
    %556 = arith.mulf %545, %476 : vector<8x32xf32>
    %557 = arith.mulf %537, %547 : vector<8x32xf32>
    %558 = arith.addf %556, %557 : vector<8x32xf32>
    %559 = math.tanh %558 : vector<8x32xf32>
    %560 = arith.mulf %555, %559 : vector<8x32xf32>
    %561 = vector.extract_strided_slice %529 {offsets = [0, 0], sizes = [8, 32], strides = [1, 1]} : vector<8x128xf32> to vector<8x32xf32>
    %cst_197 = arith.constant 5.000000e-01 : f32
    %562 = vector.broadcast %cst_197 : f32 to vector<8x32xf32>
    %563 = arith.mulf %562, %561 : vector<8x32xf32>
    %564 = math.tanh %563 : vector<8x32xf32>
    %cst_198 = arith.constant 1.000000e+00 : f32
    %565 = vector.broadcast %cst_198 : f32 to vector<8x32xf32>
    %566 = arith.addf %564, %565 : vector<8x32xf32>
    %cst_199 = arith.constant 5.000000e-01 : f32
    %567 = vector.broadcast %cst_199 : f32 to vector<8x32xf32>
    %568 = arith.mulf %567, %566 : vector<8x32xf32>
    %569 = vector.extract_strided_slice %529 {offsets = [0, 32], sizes = [8, 32], strides = [1, 1]} : vector<8x128xf32> to vector<8x32xf32>
    %cst_200 = arith.constant 5.000000e-01 : f32
    %570 = vector.broadcast %cst_200 : f32 to vector<8x32xf32>
    %571 = arith.mulf %570, %569 : vector<8x32xf32>
    %572 = math.tanh %571 : vector<8x32xf32>
    %cst_201 = arith.constant 1.000000e+00 : f32
    %573 = vector.broadcast %cst_201 : f32 to vector<8x32xf32>
    %574 = arith.addf %572, %573 : vector<8x32xf32>
    %cst_202 = arith.constant 5.000000e-01 : f32
    %575 = vector.broadcast %cst_202 : f32 to vector<8x32xf32>
    %576 = arith.mulf %575, %574 : vector<8x32xf32>
    %577 = vector.extract_strided_slice %529 {offsets = [0, 64], sizes = [8, 32], strides = [1, 1]} : vector<8x128xf32> to vector<8x32xf32>
    %578 = math.tanh %577 : vector<8x32xf32>
    %579 = vector.extract_strided_slice %529 {offsets = [0, 96], sizes = [8, 32], strides = [1, 1]} : vector<8x128xf32> to vector<8x32xf32>
    %cst_203 = arith.constant 5.000000e-01 : f32
    %580 = vector.broadcast %cst_203 : f32 to vector<8x32xf32>
    %581 = arith.mulf %580, %579 : vector<8x32xf32>
    %582 = math.tanh %581 : vector<8x32xf32>
    %cst_204 = arith.constant 1.000000e+00 : f32
    %583 = vector.broadcast %cst_204 : f32 to vector<8x32xf32>
    %584 = arith.addf %582, %583 : vector<8x32xf32>
    %cst_205 = arith.constant 5.000000e-01 : f32
    %585 = vector.broadcast %cst_205 : f32 to vector<8x32xf32>
    %586 = arith.mulf %585, %584 : vector<8x32xf32>
    %587 = arith.mulf %576, %507 : vector<8x32xf32>
    %588 = arith.mulf %568, %578 : vector<8x32xf32>
    %589 = arith.addf %587, %588 : vector<8x32xf32>
    %590 = math.tanh %589 : vector<8x32xf32>
    %591 = arith.mulf %586, %590 : vector<8x32xf32>
    %592 = arith.index_cast %515 : i32 to index
    %c0_206 = arith.constant 0 : index
    %593 = vector.load %arg12[%592, %c0_206] : memref<64x32xf32, #tpu.memory_space<vmem>>, vector<8x32xf32>
    tpu.vector_store %arg12[%592, %c0_206], %560 {strides = array<i32>} : memref<64x32xf32, #tpu.memory_space<vmem>>, vector<8x32xf32>,
    %594 = arith.index_cast %518 : i32 to index
    %c0_207 = arith.constant 0 : index
    %595 = vector.load %arg13[%594, %c0_207] : memref<64x32xf32, #tpu.memory_space<vmem>>, vector<8x32xf32>
    tpu.vector_store %arg13[%594, %c0_207], %591 {strides = array<i32>} : memref<64x32xf32, #tpu.memory_space<vmem>>, vector<8x32xf32>,
    %c7_i32_208 = arith.constant 7 : i32
    %c8_i32_209 = arith.constant 8 : i32
    %596 = arith.muli %c7_i32_208, %c8_i32_209 : i32
    %597 = tpu.assume_multiple %596, 8 : i32
    %c7_i32_210 = arith.constant 7 : i32
    %598 = arith.subi %c7_i32_210, %c7_i32_208 : i32
    %c8_i32_211 = arith.constant 8 : i32
    %599 = arith.muli %598, %c8_i32_211 : i32
    %600 = tpu.assume_multiple %599, 8 : i32
    %601 = tpu.concatenate %560, %591 in 0 : vector<8x32xf32>, vector<8x32xf32> -> vector<16x32xf32>
    %602 = arith.truncf %601 : vector<16x32xf32> to vector<16x32xbf16>
    %cst_212 = arith.constant dense<0.000000e+00> : vector<16x256xf32>
    %603 = tpu.matmul %602, %17, %cst_212 {dimension_numbers = #tpu.dot_dimension_numbers<[1], [0], [0], [1], [0, 0, 1, 1], [], []>} : vector<16x32xbf16>, vector<32x256xbf16>, vector<16x256xf32> -> vector<16x256xf32>
    %604 = vector.extract_strided_slice %603 {offsets = [0, 0], sizes = [8, 128], strides = [1, 1]} : vector<16x256xf32> to vector<8x128xf32>
    %605 = vector.extract_strided_slice %603 {offsets = [8, 128], sizes = [8, 128], strides = [1, 1]} : vector<16x256xf32> to vector<8x128xf32>
    %606 = arith.index_cast %597 : i32 to index
    %c0_213 = arith.constant 0 : index
    %607 = vector.load %arg10[%606, %c0_213] : memref<64x128xf32, #tpu.memory_space<vmem>>, vector<8x128xf32>
    %608 = arith.addf %607, %604 : vector<8x128xf32>
    %609 = arith.index_cast %600 : i32 to index
    %c0_214 = arith.constant 0 : index
    %610 = vector.load %arg11[%609, %c0_214] : memref<64x128xf32, #tpu.memory_space<vmem>>, vector<8x128xf32>
    %611 = arith.addf %610, %605 : vector<8x128xf32>
    %612 = vector.extract_strided_slice %608 {offsets = [0, 0], sizes = [8, 32], strides = [1, 1]} : vector<8x128xf32> to vector<8x32xf32>
    %cst_215 = arith.constant 5.000000e-01 : f32
    %613 = vector.broadcast %cst_215 : f32 to vector<8x32xf32>
    %614 = arith.mulf %613, %612 : vector<8x32xf32>
    %615 = math.tanh %614 : vector<8x32xf32>
    %cst_216 = arith.constant 1.000000e+00 : f32
    %616 = vector.broadcast %cst_216 : f32 to vector<8x32xf32>
    %617 = arith.addf %615, %616 : vector<8x32xf32>
    %cst_217 = arith.constant 5.000000e-01 : f32
    %618 = vector.broadcast %cst_217 : f32 to vector<8x32xf32>
    %619 = arith.mulf %618, %617 : vector<8x32xf32>
    %620 = vector.extract_strided_slice %608 {offsets = [0, 32], sizes = [8, 32], strides = [1, 1]} : vector<8x128xf32> to vector<8x32xf32>
    %cst_218 = arith.constant 5.000000e-01 : f32
    %621 = vector.broadcast %cst_218 : f32 to vector<8x32xf32>
    %622 = arith.mulf %621, %620 : vector<8x32xf32>
    %623 = math.tanh %622 : vector<8x32xf32>
    %cst_219 = arith.constant 1.000000e+00 : f32
    %624 = vector.broadcast %cst_219 : f32 to vector<8x32xf32>
    %625 = arith.addf %623, %624 : vector<8x32xf32>
    %cst_220 = arith.constant 5.000000e-01 : f32
    %626 = vector.broadcast %cst_220 : f32 to vector<8x32xf32>
    %627 = arith.mulf %626, %625 : vector<8x32xf32>
    %628 = vector.extract_strided_slice %608 {offsets = [0, 64], sizes = [8, 32], strides = [1, 1]} : vector<8x128xf32> to vector<8x32xf32>
    %629 = math.tanh %628 : vector<8x32xf32>
    %630 = vector.extract_strided_slice %608 {offsets = [0, 96], sizes = [8, 32], strides = [1, 1]} : vector<8x128xf32> to vector<8x32xf32>
    %cst_221 = arith.constant 5.000000e-01 : f32
    %631 = vector.broadcast %cst_221 : f32 to vector<8x32xf32>
    %632 = arith.mulf %631, %630 : vector<8x32xf32>
    %633 = math.tanh %632 : vector<8x32xf32>
    %cst_222 = arith.constant 1.000000e+00 : f32
    %634 = vector.broadcast %cst_222 : f32 to vector<8x32xf32>
    %635 = arith.addf %633, %634 : vector<8x32xf32>
    %cst_223 = arith.constant 5.000000e-01 : f32
    %636 = vector.broadcast %cst_223 : f32 to vector<8x32xf32>
    %637 = arith.mulf %636, %635 : vector<8x32xf32>
    %638 = arith.mulf %627, %558 : vector<8x32xf32>
    %639 = arith.mulf %619, %629 : vector<8x32xf32>
    %640 = arith.addf %638, %639 : vector<8x32xf32>
    %641 = math.tanh %640 : vector<8x32xf32>
    %642 = arith.mulf %637, %641 : vector<8x32xf32>
    %643 = vector.extract_strided_slice %611 {offsets = [0, 0], sizes = [8, 32], strides = [1, 1]} : vector<8x128xf32> to vector<8x32xf32>
    %cst_224 = arith.constant 5.000000e-01 : f32
    %644 = vector.broadcast %cst_224 : f32 to vector<8x32xf32>
    %645 = arith.mulf %644, %643 : vector<8x32xf32>
    %646 = math.tanh %645 : vector<8x32xf32>
    %cst_225 = arith.constant 1.000000e+00 : f32
    %647 = vector.broadcast %cst_225 : f32 to vector<8x32xf32>
    %648 = arith.addf %646, %647 : vector<8x32xf32>
    %cst_226 = arith.constant 5.000000e-01 : f32
    %649 = vector.broadcast %cst_226 : f32 to vector<8x32xf32>
    %650 = arith.mulf %649, %648 : vector<8x32xf32>
    %651 = vector.extract_strided_slice %611 {offsets = [0, 32], sizes = [8, 32], strides = [1, 1]} : vector<8x128xf32> to vector<8x32xf32>
    %cst_227 = arith.constant 5.000000e-01 : f32
    %652 = vector.broadcast %cst_227 : f32 to vector<8x32xf32>
    %653 = arith.mulf %652, %651 : vector<8x32xf32>
    %654 = math.tanh %653 : vector<8x32xf32>
    %cst_228 = arith.constant 1.000000e+00 : f32
    %655 = vector.broadcast %cst_228 : f32 to vector<8x32xf32>
    %656 = arith.addf %654, %655 : vector<8x32xf32>
    %cst_229 = arith.constant 5.000000e-01 : f32
    %657 = vector.broadcast %cst_229 : f32 to vector<8x32xf32>
    %658 = arith.mulf %657, %656 : vector<8x32xf32>
    %659 = vector.extract_strided_slice %611 {offsets = [0, 64], sizes = [8, 32], strides = [1, 1]} : vector<8x128xf32> to vector<8x32xf32>
    %660 = math.tanh %659 : vector<8x32xf32>
    %661 = vector.extract_strided_slice %611 {offsets = [0, 96], sizes = [8, 32], strides = [1, 1]} : vector<8x128xf32> to vector<8x32xf32>
    %cst_230 = arith.constant 5.000000e-01 : f32
    %662 = vector.broadcast %cst_230 : f32 to vector<8x32xf32>
    %663 = arith.mulf %662, %661 : vector<8x32xf32>
    %664 = math.tanh %663 : vector<8x32xf32>
    %cst_231 = arith.constant 1.000000e+00 : f32
    %665 = vector.broadcast %cst_231 : f32 to vector<8x32xf32>
    %666 = arith.addf %664, %665 : vector<8x32xf32>
    %cst_232 = arith.constant 5.000000e-01 : f32
    %667 = vector.broadcast %cst_232 : f32 to vector<8x32xf32>
    %668 = arith.mulf %667, %666 : vector<8x32xf32>
    %669 = arith.mulf %658, %589 : vector<8x32xf32>
    %670 = arith.mulf %650, %660 : vector<8x32xf32>
    %671 = arith.addf %669, %670 : vector<8x32xf32>
    %672 = math.tanh %671 : vector<8x32xf32>
    %673 = arith.mulf %668, %672 : vector<8x32xf32>
    %674 = arith.index_cast %597 : i32 to index
    %c0_233 = arith.constant 0 : index
    %675 = vector.load %arg12[%674, %c0_233] : memref<64x32xf32, #tpu.memory_space<vmem>>, vector<8x32xf32>
    tpu.vector_store %arg12[%674, %c0_233], %642 {strides = array<i32>} : memref<64x32xf32, #tpu.memory_space<vmem>>, vector<8x32xf32>,
    %676 = arith.index_cast %600 : i32 to index
    %c0_234 = arith.constant 0 : index
    %677 = vector.load %arg13[%676, %c0_234] : memref<64x32xf32, #tpu.memory_space<vmem>>, vector<8x32xf32>
    tpu.vector_store %arg13[%676, %c0_234], %673 {strides = array<i32>} : memref<64x32xf32, #tpu.memory_space<vmem>>, vector<8x32xf32>,
    %c8_i32_235 = arith.constant 8 : i32
    %c0_236 = arith.constant 0 : index
    %c0_237 = arith.constant 0 : index
    %678 = vector.load %arg14[%c0_236, %c0_237] : memref<8x32xf32, #tpu.memory_space<vmem>>, vector<8x32xf32>
    tpu.vector_store %arg14[%c0_236, %c0_237], %642 {strides = array<i32>} : memref<8x32xf32, #tpu.memory_space<vmem>>, vector<8x32xf32>,
    %c0_238 = arith.constant 0 : index
    %c0_239 = arith.constant 0 : index
    %679 = vector.load %arg15[%c0_238, %c0_239] : memref<8x32xf32, #tpu.memory_space<vmem>>, vector<8x32xf32>
    tpu.vector_store %arg15[%c0_238, %c0_239], %640 {strides = array<i32>} : memref<8x32xf32, #tpu.memory_space<vmem>>, vector<8x32xf32>,
    %c0_240 = arith.constant 0 : index
    %c0_241 = arith.constant 0 : index
    %680 = vector.load %arg16[%c0_240, %c0_241] : memref<8x32xf32, #tpu.memory_space<vmem>>, vector<8x32xf32>
    tpu.vector_store %arg16[%c0_240, %c0_241], %673 {strides = array<i32>} : memref<8x32xf32, #tpu.memory_space<vmem>>, vector<8x32xf32>,
    %c0_242 = arith.constant 0 : index
    %c0_243 = arith.constant 0 : index
    %681 = vector.load %arg17[%c0_242, %c0_243] : memref<8x32xf32, #tpu.memory_space<vmem>>, vector<8x32xf32>
    tpu.vector_store %arg17[%c0_242, %c0_243], %671 {strides = array<i32>} : memref<8x32xf32, #tpu.memory_space<vmem>>, vector<8x32xf32>,
    %c0_244 = arith.constant 0 : index
    %c0_245 = arith.constant 0 : index
    %682 = vector.load %arg12[%c0_244, %c0_245] : memref<64x32xf32, #tpu.memory_space<vmem>>, vector<64x32xf32>
    %683 = arith.truncf %682 : vector<64x32xf32> to vector<64x32xbf16>
    %c0_246 = arith.constant 0 : index
    %c0_247 = arith.constant 0 : index
    %684 = vector.load %arg8[%c0_246, %c0_247] : memref<64x32xbf16, #tpu.memory_space<vmem>>, vector<64x32xbf16>
    tpu.vector_store %arg8[%c0_246, %c0_247], %683 {strides = array<i32>} : memref<64x32xbf16, #tpu.memory_space<vmem>>, vector<64x32xbf16>,
    %c0_248 = arith.constant 0 : index
    %c0_249 = arith.constant 0 : index
    %685 = vector.load %arg13[%c0_248, %c0_249] : memref<64x32xf32, #tpu.memory_space<vmem>>, vector<64x32xf32>
    %686 = arith.truncf %685 : vector<64x32xf32> to vector<64x32xbf16>
    %c0_250 = arith.constant 0 : index
    %c0_251 = arith.constant 0 : index
    %687 = vector.load %arg9[%c0_250, %c0_251] : memref<64x32xbf16, #tpu.memory_space<vmem>>, vector<64x32xbf16>
    tpu.vector_store %arg9[%c0_250, %c0_251], %686 {strides = array<i32>} : memref<64x32xbf16, #tpu.memory_space<vmem>>, vector<64x32xbf16>,
    return
  }
  func.func @transform_0(%arg0: i32) -> (i32, i32) {
    %c0_i32 = arith.constant 0 : i32
    %c0_i32_0 = arith.constant 0 : i32
    return %arg0, %c0_i32 : i32, i32
  }
  func.func @transform_1(%arg0: i32) -> (i32, i32) {
    %c0_i32 = arith.constant 0 : i32
    %0 = arith.subi %c0_i32, %arg0 : i32
    %c0_i32_0 = arith.constant 0 : i32
    %c0_i32_1 = arith.constant 0 : i32
    return %0, %c0_i32_0 : i32, i32
  }
  func.func @transform_2(%arg0: i32) -> (i32, i32) {
    %c0_i32 = arith.constant 0 : i32
    %c0_i32_0 = arith.constant 0 : i32
    %c0_i32_1 = arith.constant 0 : i32
    return %c0_i32, %c0_i32_0 : i32, i32
  }
  func.func @transform_3(%arg0: i32) -> (i32, i32) {
    %c0_i32 = arith.constant 0 : i32
    %c0_i32_0 = arith.constant 0 : i32
    %c0_i32_1 = arith.constant 0 : i32
    return %c0_i32, %c0_i32_0 : i32, i32
  }
  func.func @transform_4(%arg0: i32) -> (i32, i32) {
    %c0_i32 = arith.constant 0 : i32
    %c0_i32_0 = arith.constant 0 : i32
    %c0_i32_1 = arith.constant 0 : i32
    return %c0_i32, %c0_i32_0 : i32, i32
  }
  func.func @transform_5(%arg0: i32) -> (i32, i32) {
    %c0_i32 = arith.constant 0 : i32
    %c0_i32_0 = arith.constant 0 : i32
    %c0_i32_1 = arith.constant 0 : i32
    return %c0_i32, %c0_i32_0 : i32, i32
  }
  func.func @transform_6(%arg0: i32) -> (i32, i32) {
    %c0_i32 = arith.constant 0 : i32
    %c0_i32_0 = arith.constant 0 : i32
    %c0_i32_1 = arith.constant 0 : i32
    return %c0_i32, %c0_i32_0 : i32, i32
  }
  func.func @transform_7(%arg0: i32) -> (i32, i32) {
    %c0_i32 = arith.constant 0 : i32
    %c0_i32_0 = arith.constant 0 : i32
    return %arg0, %c0_i32 : i32, i32
  }
  func.func @transform_8(%arg0: i32) -> (i32, i32) {
    %c0_i32 = arith.constant 0 : i32
    %0 = arith.subi %c0_i32, %arg0 : i32
    %c0_i32_0 = arith.constant 0 : i32
    %c0_i32_1 = arith.constant 0 : i32
    return %0, %c0_i32_0 : i32, i32
  }
}

</mosaic_0001>

<bundles_post_ra>
// kernel: tpu_custom_call.1
= control target key start
LH: loop header
LB: loop body
LE: loop exit
PB: predicated region body
PF: predicated region fallthrough
CT: control target
= control target key end

     0   :  { %6 = vsyncpa [#allocation3], 0  ;;  %s482_s0 = inlined_call_operand.hbm [shape: f32[8,128], index: 0, kind: input, shape index: {}]   ;;  %s483_s1 = inlined_call_operand.hbm [shape: f32[16,128], index: 1, kind: output, shape index: {}]  }
   0x1   :  { %7 = vsyncpa [#allocation4], 0 }
   0x2   :  { %9 = vsyncpa [#allocation4 + $0x1], 0  ;;  %s352_s6 = smov 0   ;;  %s354_s7 = smov 0  }
   0x3   :  { %s356_s8 = smov 0   ;;  %s358_s9 = smov 0  }
   0x4 LB: > { %s373_s10 = sadd.s32 4294967295, %s338_s9   ;;  %s184_s11 = sadd.s32 4294967294, %s338_s9   ;;  %s338_s9 = sphi %s358_s9, %s499_s9   ;;  %s334_s8 = sphi %s356_s8, %s498_s8   ;;  %s330_s7 = sphi %s354_s7, %s497_s7   ;;  %s326_s6 = sphi %s352_s6, %s496_s6  }
   0x5   : > { %s377_s12 = sadd.s32 1, %s338_s9   ;;  %s43_s13 = sadd.s32 1, %s334_s8 }
   0x6   : > { %s40_s14 = ssub.s32 %s338_s9, %s377_s12  ;;  %p53_p0 = scmp.ne.s32.totalorder %s334_s8, %s330_s7 }
   0x7   : > { %p41_p1 = scmp.eq.s32.totalorder %s40_s14, 0  ;;  %p54_p2 = scmp.eq.s32.totalorder %s373_s10, 1 }
   0x8   : > { %p59_p3 = scmp.ne.s32.totalorder %s330_s7, %s326_s6  ;;  %p60_p4 = scmp.eq.s32.totalorder %s184_s11, 1 }
   0x9   : > { %s388_s15 = scalar_select %p41_p1, %s334_s8, %s43_s13  }
   0xa   : > { %p390_p5 = por %p54_p2, %p53_p0  ;;  %p394_p6 = por %p60_p4, %p59_p3 }
   0xb   : > { %p185_p7 = scmp.ge.s32.totalorder %s338_s9, 1  ;;  %p67_p8 = scmp.lt.s32.totalorder %s338_s9, 3 }
   0xc   : > { %s487_s16 = scalar_select %p390_p5, 1, 0 }
   0xd   : > { %s488_s17 = scalar_select %p394_p6, 1, 0 }
   0xe   : > { %p484_p9 = scmp.eq.s32.totalorder %s373_s10, 0  ;;  %p401_p10 = pnand %p185_p7, %p67_p8 }
   0xf   : > { %s340_s19 = smov [#allocation2]   ;;  %s244_s24 = scalar_lea.hbm %s482_s0, 128 }
  0x10   : > { %s489_s18 = scalar_select %p401_p10, 1, 0 }
  0x11   : > { %s80_s20 = sshll.u32 %s340_s19, 4  ;;  %p200_p11 = pneg %p401_p10  ;;  %s81_s20 = int_to_ptr.vmem [resolvable:$true] %s80_s20 }
  0x12   : > { %p245_p13 = scmp.ne.s32.totalorder %s482_s0, %s244_s24  ;;  %p251_p3 = scmp.lt.u32.totalorder %s244_s24, %s482_s0 }
  0x13   : > { %p409_p12 = pnand %p484_p9, %p200_p11 }
  0x15   : > { %p246_p0 = pneg %p409_p12 }
  0x17   : > { %p247_p1 = pnand %p246_p0, %p245_p13 }
  0x19   : > { %p248_p2 = pneg %p247_p1 }
  0x1b   : > { %p253_p4 = pnand %p251_p3, %p248_p2 }
  0x1d   : > { %256 = shalt.err (!%p253_p4)
}
  0x1e   : > { %s257_s29 = scalar_lea.vmem %s81_s20, 128  ;;  %p265_p9 = scmp.lt.s32.totalorder %s81_s20, %s81_s20 }
  0x1f   : > { %p258_p7 = scmp.ne.s32.totalorder %s81_s20, %s257_s29  ;;  %p266_p6 = scmp.lt.s32.totalorder %s257_s29, %s257_s29 }
  0x21   : > { %p260_p8 = pnand %p258_p7, %p246_p0  ;;  %p267_p5 = por %p266_p6, %p265_p9 }
  0x23   : > { %p261_p11 = pneg %p260_p8 }
  0x25   : > { %p268_p10 = pnand %p267_p5, %p261_p11 }
  0x27   : > { %271 = shalt.err (!%p268_p10)
}
  0x28   : > { %203 = dma.hbm_to_vmem [thread:$0]  (!%p409_p12), %s482_s0, 128, %s81_s20, [#allocation3]  }
  0x29   : > { %p491_p13 = scmp.ne.s32.totalorder %s489_s18, 0 }
  0x2a   : > { %p492_p1 = scmp.eq.s32.totalorder (!%p491_p13), %s373_s10, 0 }
  0x2b   : > { %93 = sbr.rel (%p491_p13) target bundleno = 77 (0x4d), region = 24 }
  0x32   : > { %317 = dma.done.wait (%p492_p1), [#allocation3], 128   ;;  %p493_p0 = pmov %p492_p1 }
  0x33   : > { %s105_s3 = sand.u32 1, %s330_s7   ;;  %s191_s13 = sshll.u32 %s373_s10, 7  ;;  %v108_v0 = vld [vmem:[#allocation2] sm:$0xff] }
  0x34   : > { %319 = vsyncadd (%p493_p0), [#allocation3], 4294967168  ;;  %s189_s4 = sshll.u32 %s105_s3, 3  ;;  %v109_v1 = vmul.f32 2.0, %v108_v0  ;;  %s442_s19 = scalar_lea.hbm %s483_s1, %s191_s13 }
  0x35   : > { %s107_s5 = scalar_lea.vmem [#allocation5], %s189_s4  ;;  %s112_s20 = scalar_lea.sflag [#allocation4], %s105_s3 }
  0x36   : > { %s125_s11 = sshll.u32 %s107_s5, 4  ;;  %110 = vst [vmem:[%s107_s5] sm:$0xff] %v109_v1  ;;  %p494_p6 = scmp.ne.s32.totalorder %s487_s16, 0  ;;  %s437_s11 = int_to_ptr.vmem [resolvable:$true] %s125_s11 }
  0x37   : > { %s272_s21 = scalar_lea.vmem %s437_s11, 128  ;;  %s341_s10 = smov [#allocation5]  }
  0x38   : > { %p273_p5 = scmp.ne.s32.totalorder %s437_s11, %s272_s21  ;;  %s276_s22 = sshll.u32 %s341_s10, 4  ;;  %s277_s22 = int_to_ptr.vmem [resolvable:$false] %s276_s22 }
  0x39   : > { %s278_s23 = scalar_lea.vmem %s277_s22, 256  ;;  %p279_p12 = scmp.lt.s32.totalorder %s437_s11, %s277_s22 }
  0x3a   : > { %p274_p9 = pnand %p273_p5, %p494_p6  ;;  %p280_p2 = scmp.lt.s32.totalorder %s278_s23, %s272_s21 }
  0x3c   : > { %p275_p10 = pneg %p274_p9  ;;  %p281_p3 = por %p280_p2, %p279_p12 }
  0x3e   : > { %p282_p4 = pnand %p281_p3, %p275_p10 }
  0x40   : > { %285 = shalt.err (!%p282_p4)
}
  0x41   : > { %s286_s24 = scalar_lea.hbm %s442_s19, 128  ;;  %s290_s27 = scalar_lea.hbm %s483_s1, 256 }
  0x42   : > { %p287_p7 = scmp.ne.s32.totalorder %s442_s19, %s286_s24  ;;  %p291_p13 = scmp.lt.u32.totalorder %s442_s19, %s483_s1 }
  0x43   : > { %p292_p1 = scmp.lt.u32.totalorder %s290_s27, %s286_s24  ;;  %p294_p5 = scmp.lt.u32.totalorder %s286_s24, %s442_s19 }
  0x44   : > { %p288_p8 = pnand %p287_p7, %p494_p6 }
  0x45   : > { %p293_p0 = por %p292_p1, %p291_p13 }
  0x46   : > { %p289_p11 = pneg %p288_p8 }
  0x47   : > { %p295_p9 = por %p294_p5, %p293_p0 }
  0x49   : > { %p296_p10 = pnand %p295_p9, %p289_p11 }
  0x4b   : > { %299 = shalt.err (!%p296_p10)
}
  0x4c   : > { %198 = dma.vmem_to_hbm [thread:$0]  (%p494_p6), %s437_s11, 128, %s442_s19, %s112_s20  }
  0x4d PF: > { %p210_p12 = scmp.ge.s32.totalorder %s338_s9, 2  ;;  %s137_s30 = sand.u32 1, %s326_s6  }
  0x4e   : > { %p495_p2 = scmp.ne.s32.totalorder %s488_s17, 0  ;;  %s138_s2 = scalar_lea.sflag [#allocation4], %s137_s30 }
  0x50   : > { %p205_p3 = pnand %p210_p12, %p495_p2 }
  0x52   : > { %321 = dma.done.wait (!%p205_p3), %s138_s2, 128  }
  0x53   : > { %323 = vsyncadd (!%p205_p3), %s138_s2, 4294967168  ;;  %p12_p4 = scmp.ge.s32.totalorder %s377_s12, 4   ;;  %s496_s6 = smov %s330_s7 }
  0x54   : > { %s497_s7 = smov %s334_s8  ;;  %s498_s8 = smov %s388_s15 }
  0x55   : > { %s499_s9 = smov %s377_s12  ;;  %14 = sbr.rel (!%p12_p4) target bundleno = 4 (0x4), region = 61 }
  0x5c   :  { %143 = vsyncpa [#allocation3], 1 }
  0x5d   :  { %145 = vsyncpa [#allocation3 + $0x1], 1 }
  0x5e   :  { %146 = vsyncpa [#allocation4], 1 }
  0x5f   :  { %148 = vsyncpa [#allocation4 + $0x1], 1 }

// kernel: tpu_custom_call.1
= control target key start
LH: loop header
LB: loop body
LE: loop exit
PB: predicated region body
PF: predicated region fallthrough
CT: control target
= control target key end

     0   :  { %vm69_vm0 = vcmask 261120   ;;  %v1622_v1 = vmov 0.0   ;;  %v1624_v19 = vmov 0   ;;  %vm1308_vm1 = vcmask 257024   ;;  %s2041_s2 = inlined_call_operand.vmem [shape: bf16[32,128], index: 2, kind: input, shape index: {}]   ;;  %s2042_s4 = inlined_call_operand.vmem [shape: bf16[32,128], index: 4, kind: input, shape index: {}]   ;;  %s2043_s0 = inlined_call_operand.vmem [shape: bf16[64,32], index: 0, kind: input, shape index: {}]   ;;  %s2044_s6 = inlined_call_operand.vmem [shape: bf16[32,256], index: 6, kind: input, shape index: {}]   ;;  %s2045_s1 = inlined_call_operand.vmem [shape: bf16[64,32], index: 1, kind: input, shape index: {}]   ;;  %s2046_s3 = inlined_call_operand.vmem [shape: f32[1,128], index: 3, kind: input, shape index: {}]   ;;  %s2047_s5 = inlined_call_operand.vmem [shape: f32[1,128], index: 5, kind: input, shape index: {}]   ;;  %s2048_s7 = inlined_call_operand.vmem [shape: bf16[64,32], index: 7, kind: output, shape index: {0}]   ;;  %s2049_s8 = inlined_call_operand.vmem [shape: bf16[64,32], index: 8, kind: output, shape index: {1}]  }
   0x1   :  { %v1508_v0 = vld [vmem:[%s2041_s2] sm:$0xff]   ;;  %70 = vst.msk [vmem:[#allocation6] sm:$0xff] %vm69_vm0, %v1622_v1  ;;  %72 = vst.msk [vmem:[#allocation8] sm:$0xff] %vm69_vm0, %v1622_v1  ;;  %v1509_v2 = vld [vmem:[%s2041_s2 + $0x8] sm:$0xff]  }
   0x2   :  { %71 = vst.msk [vmem:[#allocation7] sm:$0xff] %vm69_vm0, %v1622_v1  ;;  %73 = vst.msk [vmem:[#allocation9] sm:$0xff] %vm69_vm0, %v1622_v1  ;;  %1479 = vmatprep.subr.bf16.mxu0 %v1508_v0  ;;  %v1510_v3 = vld [vmem:[%s2042_s4] sm:$0xff]   ;;  %v1512_v5 = vld [vmem:[%s2043_s0 + $0x8] sm:$0xff]  }
   0x3   :  { %1480 = vmatpush3.bf16.msra.mxu0 %v1508_v0  ;;  %v1511_v4 = vld [vmem:[%s2043_s0] sm:$0xff]   ;;  %1491 = vmatprep.subr.bf16.mxu1 %v1510_v3  ;;  %v1516_v8 = vld [vmem:[%s2042_s4 + $0x8] sm:$0xff]   ;;  %v1519_v11 = vld [vmem:[%s2043_s0 + $0x10] sm:$0xff]  }
   0x4   :  { %1481 = vmatprep.subr.bf16.mxu0 %v1509_v2  ;;  %1483 = vmatprep.mubr.msk.bf16.mxu0 %vm69_vm0, %v1511_v4  ;;  %v1695_v6 = vld [vmem:[%s2044_s6 + $0x4] ss:$8 sps:$4 sm:$0xff]   ;;  %v1700_v7 = vld [vmem:[%s2044_s6] ss:$8 sps:$4 sm:$0xff]   ;;  %v1722_v12 = vld [vmem:[%s2044_s6 + $0x14] ss:$8 sps:$4 sm:$0xff]  }
   0x5   :  { %1492 = vmatpush3.bf16.msra.mxu1 %v1510_v3  ;;  %v1517_v9 = vld [vmem:[%s2045_s1] sm:$0xff]   ;;  %v1518_v10 = vld [vmem:[%s2045_s1 + $0x8] sm:$0xff]   ;;  %v1727_v13 = vld [vmem:[%s2044_s6 + $0x10] ss:$8 sps:$4 sm:$0xff]   ;;  %s1623_s6 = smov 32  }
   0x6   :  { %1493 = vmatprep.subr.bf16.mxu1 %v1516_v8  ;;  %1495 = vmatprep.mubr.msk.bf16.mxu1 %vm69_vm0, %v1517_v9  ;;  %v1524_v14 = vld [vmem:[%s2045_s1 + $0x10] sm:$0xff]   ;;  %v1520_v15 = vld [vmem:[%s2043_s0 + $0x18] sm:$0xff]   ;;  %v1401_v23 = vld [vmem:[%s2046_s3] ss:$0 sm:$0xff]  ;;  %s1625_s3 = smov 64  }
   0x7   :  { %1482 = vmatpush3.bf16.msra.mxu0 %v1509_v2  ;;  %v1525_v17 = vld [vmem:[%s2045_s1 + $0x18] sm:$0xff]   ;;  %v1412_v27 = vld [vmem:[%s2047_s5] ss:$0 sm:$0xff]  ;;  %s1626_s5 = smov 96  }
   0x8   :  { %379 = vmatprep.subr.bf16.mxu0 %v1695_v6  ;;  %v351_v20 = vld [vmem:[#allocation6] sm:$0xff]  ;;  %v353_v21 = vld [vmem:[#allocation8] sm:$0xff] }
   0x9   :  { %1494 = vmatpush3.bf16.msra.mxu1 %v1516_v8  ;;  %v352_v16 = vld [vmem:[#allocation7] sm:$0xff]  ;;  %v354_v18 = vld [vmem:[#allocation9] sm:$0xff]  ;;  %v355_v22 = vpack.c.bf16 %v353_v21, %v351_v20 }
   0xa   :  { %1484 = vmatmul.mubr.msk.bf16.vlgmr.msra.gmra.mrb[0].mxu0 %vm69_vm0, %v1512_v5  ;;  %495 = vmatprep.subr.bf16.mxu1 %v1695_v6 }
   0xb   :  { %380 = vmatpush1.bf16.msra.mxu0 %v1700_v7  ;;  %1487 = vmatprep.mubr.msk.bf16.mxu0 %vm69_vm0, %v1519_v11 }
   0xc   :  { %1496 = vmatmul.mubr.msk.bf16.vlgmr.msra.gmra.mrb[0].mxu1 %vm69_vm0, %v1518_v10  ;;  %381 = vmatprep.subr.bf16.mxu0 %v1722_v12 }
   0xd   :  { %496 = vmatpush1.bf16.msra.mxu1 %v1700_v7  ;;  %1499 = vmatprep.mubr.msk.bf16.mxu1 %vm69_vm0, %v1524_v14 }
   0xe   :  { %431 = vrot.lane.b32.xlu1 %v352_v16, %s1623_s6  ;;  %497 = vmatprep.subr.bf16.mxu1 %v1722_v12 }
   0xf   :  { %382 = vmatpush1.bf16.msra.mxu0 %v1727_v13 }
  0x10   :  { %605 = vmatprep.subr.bf16.mxu0 %v1695_v6 }
  0x11   :  { %498 = vmatpush1.bf16.msra.mxu1 %v1727_v13 }
  0x12   :  { %1488 = vmatmul.mubr.msk.bf16.gmra.mrb[4].mxu0 %vm69_vm0, %v1520_v15  ;;  %715 = vmatprep.subr.bf16.mxu1 %v1695_v6 }
  0x13   :  { %411 = vmatprep.mubr.bf16.mxu0 %v1624_v19  ;;  %457 = vrot.lane.b32.xlu1 %v354_v18, %s1623_s6 }
  0x14   :  { %1500 = vmatmul.mubr.msk.bf16.gmra.mrb[4].mxu1 %vm69_vm0, %v1525_v17 }
  0x15   :  { %527 = vmatprep.mubr.bf16.mxu1 %v1624_v19 }
  0x1a   :  { %1427 = vmatmul.mubr.msk.bf16.vlgmr.msra.gmra.mrb[8].mxu0 %vm69_vm0, %v355_v22 }
  0x1b   :  { %606 = vmatpush1.bf16.msra.mxu0 %v1700_v7  ;;  %637 = vmatprep.mubr.bf16.mxu0 %v1624_v19 }
  0x1c   :  { %607 = vmatprep.subr.bf16.mxu0 %v1722_v12 }
  0x1f   :  { %608 = vmatpush1.bf16.msra.mxu0 %v1727_v13 }
  0x20   :  { %825 = vmatprep.subr.bf16.mxu0 %v1695_v6 }
  0x80   :  { %v432_v17 = vpop.permute.xlu1 %431 }
  0x85   :  { %v458_v20 = vpop.permute.xlu1 %457 }
  0xdd   :  { %v1485_v24 = vpop.f32.mrb[0].mxu0 }
  0xde   :  { %v1763_v25 = vadd.f32 %v1485_v24, %v1401_v23  ;;  %v172_v26 = vpop.f32.mrb[1].mxu0 }
  0xdf   :  { %v1486_v28 = vpop.f32.mrb[2].mxu0  ;;  %v1497_v31 = vpop.f32.mrb[0].mxu1  ;;  %v173_v54 = vadd.f32 %v1401_v23, %v172_v26 }
  0xe0   :  { %v1768_v29 = vadd.f32 %v1486_v28, %v1401_v23  ;;  %v175_v30 = vpop.f32.mrb[3].mxu0  ;;  %v1772_v33 = vadd.f32 %v1497_v31, %v1412_v27  ;;  %v308_v34 = vpop.f32.mrb[1].mxu1 }
  0xe1   :  { %v1770_v32 = vadd.f32 %v1401_v23, %v175_v30  ;;  %v1774_v35 = vadd.f32 %v1412_v27, %v308_v34  ;;  %v1498_v36 = vpop.f32.mrb[2].mxu1 }
  0xe2   :  { %v1776_v37 = vadd.f32 %v1498_v36, %v1412_v27  ;;  %v311_v38 = vpop.f32.mrb[3].mxu1 }
  0xe3   :  { %v1778_v39 = vadd.f32 %v1412_v27, %v311_v38 }
  0xe5   :  { %v1489_v40 = vpop.f32.mrb[4].mxu0 }
  0xe6   :  { %v1780_v41 = vadd.f32 %v1489_v40, %v1401_v23  ;;  %v188_v42 = vpop.f32.mrb[5].mxu0 }
  0xe7   :  { %v1782_v43 = vadd.f32 %v1401_v23, %v188_v42  ;;  %v1490_v44 = vpop.f32.mrb[6].mxu0  ;;  %v1501_v47 = vpop.f32.mrb[4].mxu1 }
  0xe8   :  { %v1784_v45 = vadd.f32 %v1490_v44, %v1401_v23  ;;  %v191_v46 = vpop.f32.mrb[7].mxu0  ;;  %v1788_v49 = vadd.f32 %v1501_v47, %v1412_v27  ;;  %v324_v50 = vpop.f32.mrb[5].mxu1 }
  0xe9   :  { %v1786_v48 = vadd.f32 %v1401_v23, %v191_v46  ;;  %v1790_v51 = vadd.f32 %v1412_v27, %v324_v50  ;;  %v1502_v52 = vpop.f32.mrb[6].mxu1 }
  0xea   :  { %v327_v53 = vpop.f32.mrb[7].mxu1  ;;  %v336_v56 = vadd.f32 %v1502_v52, %v1412_v27 }
  0xeb   :  { %v1792_v55 = vadd.f32 %v1412_v27, %v327_v53 }
  0xed   :  { %v413_v57 = vpop.f32.mrb[8].mxu0 }
  0xee   :  { %v421_v58 = vadd.f32 %v413_v57, %v173_v54  ;;  %v415_v59 = vpop.f32.mrb[9].mxu0 }
  0xef   :  { %v416_v60 = vpop.f32.mrb[10].mxu0 }
  0xf0   :  { %1526 = vtanh.f32 %v421_v58  ;;  %v417_v61 = vpop.f32.mrb[11].mxu0  ;;  %v425_v1 = vmul.f32 0.5, %v421_v58 }
  0xf1   :  { %v424_v62 = vadd.f32 %v417_v61, %v336_v56 }
  0xf3   :  { %1528 = vtanh.f32 %v424_v62  ;;  %v451_v2 = vmul.f32 0.5, %v424_v62 }
  0xf4   :  { %1530 = vtanh.f32 %v425_v1 }
  0xf5   :  { %1532 = vtanh.f32 %v451_v2 }
  0xfa   :  { %v1527_v63 = vpop.eup %1526 }
  0xfb   :  { %436 = vrot.lane.b32.xlu0 %v1527_v63, %s1625_s3 }
  0xfd   :  { %v1529_v0 = vpop.eup %1528 }
  0xfe   :  { %v1531_v3 = vpop.eup %1530 }
  0xff   :  { %462 = vrot.lane.b32.xlu0 %v1529_v0, %s1625_s3  ;;  %v427_v4 = vadd.f32 1.0, %v1531_v3  ;;  %v1533_v5 = vpop.eup %1532 }
 0x100   :  { %v453_v9 = vadd.f32 1.0, %v1533_v5 }
 0x101   :  { %v428_v8 = vmul.f32 0.5, %v427_v4 }
 0x102   :  { %v454_v14 = vmul.f32 0.5, %v453_v9 }
 0x103   :  { %v434_v18 = vmul.f32 %v432_v17, %v428_v8 }
 0x104   :  { %v460_v23 = vmul.f32 %v458_v20, %v454_v14 }
 0x16d   :  { %v437_v10 = vpop.permute.xlu0 %436 }
 0x16e   :  { %v439_v11 = vmul.f32 %v437_v10, %v428_v8 }
 0x170   :  { %441 = vrot.lane.b32.xlu0 %v439_v11, %s1623_s6 }
 0x171   :  { %v463_v15 = vpop.permute.xlu0 %462 }
 0x172   :  { %v465_v16 = vmul.f32 %v463_v15, %v454_v14 }
 0x174   :  { %467 = vrot.lane.b32.xlu1 %v465_v16, %s1623_s6 }
 0x1e2   :  { %v442_v21 = vpop.permute.xlu0 %441 }
 0x1e3   :  { %v444_v22 = vadd.f32 %v442_v21, %v434_v18 }
 0x1e5   :  { %1534 = vtanh.f32 %v444_v22 }
 0x1e6   :  { %v468_v24 = vpop.permute.xlu1 %467 }
 0x1e7   :  { %v470_v26 = vadd.f32 %v468_v24, %v460_v23 }
 0x1e9   :  { %1536 = vtanh.f32 %v470_v26 }
 0x1ef   :  { %v1535_v27 = vpop.eup %1534 }
 0x1f0   :  { %447 = vrot.lane.b32.xlu0 %v1535_v27, %s1625_s3 }
 0x1f3   :  { %v1537_v28 = vpop.eup %1536 }
 0x1f4   :  { %473 = vrot.lane.b32.xlu1 %v1537_v28, %s1625_s3 }
 0x262   :  { %v448_v30 = vpop.permute.xlu0 %447 }
 0x263   :  { %v1800_v34 = vmul.f32 %v448_v30, %v428_v8 }
 0x266   :  { %v474_v31 = vpop.permute.xlu1 %473 }
 0x267   :  { %v1802_v36 = vmul.f32 %v474_v31, %v454_v14 }
 0x269   :  { %v488_v38 = vpack.c.bf16 %v1802_v36, %v1800_v34 }
 0x26b   :  { %490 = vrot.lane.b32.xlu0 %v488_v38, %s1623_s6 }
 0x2dd   :  { %v491_v40 = vpop.permute.xlu0 %490 }
 0x2de   :  { %1428 = vmatmul.mubr.msk.bf16.vlgmr.msra.gmra.mrb[8].mxu1 %vm69_vm0, %v491_v40 }
 0x2df   :  { %716 = vmatpush1.bf16.msra.mxu1 %v1700_v7  ;;  %747 = vmatprep.mubr.bf16.mxu1 %v1624_v19 }
 0x2e0   :  { %717 = vmatprep.subr.bf16.mxu1 %v1722_v12 }
 0x2e3   :  { %718 = vmatpush1.bf16.msra.mxu1 %v1727_v13 }
 0x2e4   :  { %935 = vmatprep.subr.bf16.mxu1 %v1695_v6 }
 0x3b1   :  { %v529_v42 = vpop.f32.mrb[8].mxu1 }
 0x3b2   :  { %v538_v44 = vadd.f32 %v529_v42, %v1770_v32  ;;  %v531_v46 = vpop.f32.mrb[9].mxu1 }
 0x3b3   :  { %v532_v47 = vpop.f32.mrb[10].mxu1 }
 0x3b4   :  { %1538 = vtanh.f32 %v538_v44  ;;  %v533_v50 = vpop.f32.mrb[11].mxu1  ;;  %v542_v56 = vmul.f32 0.5, %v538_v44 }
 0x3b5   :  { %v541_v52 = vadd.f32 %v533_v50, %v1788_v49 }
 0x3b7   :  { %1540 = vtanh.f32 %v541_v52  ;;  %v564_v57 = vmul.f32 0.5, %v541_v52 }
 0x3b8   :  { %1542 = vtanh.f32 %v542_v56 }
 0x3b9   :  { %1544 = vtanh.f32 %v564_v57 }
 0x3be   :  { %v1539_v53 = vpop.eup %1538 }
 0x3bf   :  { %549 = vrot.lane.b32.xlu1 %v1539_v53, %s1625_s3 }
 0x3c1   :  { %v1541_v54 = vpop.eup %1540 }
 0x3c2   :  { %571 = vrot.lane.b32.xlu0 %v1541_v54, %s1625_s3  ;;  %v1543_v58 = vpop.eup %1542 }
 0x3c3   :  { %v1545_v59 = vpop.eup %1544  ;;  %v544_v32 = vadd.f32 1.0, %v1543_v58 }
 0x3c4   :  { %v566_v60 = vadd.f32 1.0, %v1545_v59 }
 0x3c5   :  { %v545_v61 = vmul.f32 0.5, %v544_v32 }
 0x3c6   :  { %v567_v0 = vmul.f32 0.5, %v566_v60 }
 0x3c7   :  { %v547_v2 = vmul.f32 %v545_v61, %v444_v22 }
 0x3c8   :  { %v569_v5 = vmul.f32 %v567_v0, %v470_v26 }
 0x431   :  { %v550_v62 = vpop.permute.xlu1 %549 }
 0x432   :  { %v552_v63 = vmul.f32 %v550_v62, %v545_v61 }
 0x434   :  { %554 = vrot.lane.b32.xlu1 %v552_v63, %s1623_s6  ;;  %v572_v49 = vpop.permute.xlu0 %571 }
 0x435   :  { %v574_v1 = vmul.f32 %v572_v49, %v567_v0 }
 0x437   :  { %576 = vrot.lane.b32.xlu0 %v574_v1, %s1623_s6 }
 0x4a6   :  { %v555_v3 = vpop.permute.xlu1 %554 }
 0x4a7   :  { %v557_v4 = vadd.f32 %v555_v3, %v547_v2 }
 0x4a9   :  { %1546 = vtanh.f32 %v557_v4  ;;  %v577_v8 = vpop.permute.xlu0 %576 }
 0x4aa   :  { %v579_v9 = vadd.f32 %v577_v8, %v569_v5 }
 0x4ac   :  { %1548 = vtanh.f32 %v579_v9 }
 0x4b3   :  { %v1547_v10 = vpop.eup %1546 }
 0x4b4   :  { %560 = vrot.lane.b32.xlu1 %v1547_v10, %s1625_s3 }
 0x4b6   :  { %v1549_v11 = vpop.eup %1548 }
 0x4b7   :  { %582 = vrot.lane.b32.xlu0 %v1549_v11, %s1625_s3 }
 0x526   :  { %v561_v14 = vpop.permute.xlu1 %560 }
 0x527   :  { %v1821_v16 = vmul.f32 %v561_v14, %v545_v61 }
 0x529   :  { %v583_v15 = vpop.permute.xlu0 %582 }
 0x52a   :  { %v1823_v17 = vmul.f32 %v583_v15, %v567_v0 }
 0x52c   :  { %v598_v18 = vpack.c.bf16 %v1823_v17, %v1821_v16 }
 0x52e   :  { %600 = vrot.lane.b32.xlu1 %v598_v18, %s1623_s6 }
 0x5a0   :  { %v601_v20 = vpop.permute.xlu1 %600 }
 0x5a1   :  { %1429 = vmatmul.mubr.msk.bf16.vlgmr.msra.gmra.mrb[12].mxu0 %vm69_vm0, %v601_v20 }
 0x5a2   :  { %826 = vmatpush1.bf16.msra.mxu0 %v1700_v7  ;;  %857 = vmatprep.mubr.bf16.mxu0 %v1624_v19 }
 0x5a3   :  { %827 = vmatprep.subr.bf16.mxu0 %v1722_v12 }
 0x5a6   :  { %828 = vmatpush1.bf16.msra.mxu0 %v1727_v13 }
 0x5a7   :  { %1045 = vmatprep.subr.bf16.mxu0 %v1695_v6 }
 0x674   :  { %v639_v21 = vpop.f32.mrb[12].mxu0 }
 0x675   :  { %v648_v22 = vadd.f32 %v639_v21, %v1763_v25  ;;  %v641_v23 = vpop.f32.mrb[13].mxu0 }
 0x676   :  { %v642_v24 = vpop.f32.mrb[14].mxu0 }
 0x677   :  { %1550 = vtanh.f32 %v648_v22  ;;  %v643_v26 = vpop.f32.mrb[15].mxu0  ;;  %v652_v31 = vmul.f32 0.5, %v648_v22 }
 0x678   :  { %v651_v27 = vadd.f32 %v643_v26, %v1792_v55 }
 0x67a   :  { %1552 = vtanh.f32 %v651_v27  ;;  %v674_v38 = vmul.f32 0.5, %v651_v27 }
 0x67b   :  { %1554 = vtanh.f32 %v652_v31 }
 0x67c   :  { %1556 = vtanh.f32 %v674_v38 }
 0x681   :  { %v1551_v28 = vpop.eup %1550 }
 0x682   :  { %659 = vrot.lane.b32.xlu0 %v1551_v28, %s1625_s3 }
 0x684   :  { %v1553_v30 = vpop.eup %1552 }
 0x685   :  { %681 = vrot.lane.b32.xlu1 %v1553_v30, %s1625_s3  ;;  %v1555_v40 = vpop.eup %1554 }
 0x686   :  { %v1557_v42 = vpop.eup %1556  ;;  %v654_v25 = vadd.f32 1.0, %v1555_v40 }
 0x687   :  { %v676_v44 = vadd.f32 1.0, %v1557_v42 }
 0x688   :  { %v655_v46 = vmul.f32 0.5, %v654_v25 }
 0x689   :  { %v677_v52 = vmul.f32 0.5, %v676_v44 }
 0x68a   :  { %v657_v54 = vmul.f32 %v655_v46, %v557_v4 }
 0x68b   :  { %v679_v58 = vmul.f32 %v677_v52, %v579_v9 }
 0x6f4   :  { %v660_v47 = vpop.permute.xlu0 %659 }
 0x6f5   :  { %v662_v50 = vmul.f32 %v660_v47, %v655_v46 }
 0x6f7   :  { %664 = vrot.lane.b32.xlu0 %v662_v50, %s1623_s6  ;;  %v682_v55 = vpop.permute.xlu1 %681 }
 0x6f8   :  { %v684_v53 = vmul.f32 %v682_v55, %v677_v52 }
 0x6fa   :  { %686 = vrot.lane.b32.xlu1 %v684_v53, %s1623_s6 }
 0x769   :  { %v665_v56 = vpop.permute.xlu0 %664 }
 0x76a   :  { %v667_v57 = vadd.f32 %v665_v56, %v657_v54 }
 0x76c   :  { %1558 = vtanh.f32 %v667_v57  ;;  %v687_v59 = vpop.permute.xlu1 %686 }
 0x76d   :  { %v689_v32 = vadd.f32 %v687_v59, %v679_v58 }
 0x76f   :  { %1560 = vtanh.f32 %v689_v32 }
 0x776   :  { %v1559_v60 = vpop.eup %1558 }
 0x777   :  { %670 = vrot.lane.b32.xlu0 %v1559_v60, %s1625_s3 }
 0x779   :  { %v1561_v61 = vpop.eup %1560 }
 0x77a   :  { %692 = vrot.lane.b32.xlu1 %v1561_v61, %s1625_s3 }
 0x7e9   :  { %v671_v62 = vpop.permute.xlu0 %670 }
 0x7ea   :  { %v1842_v0 = vmul.f32 %v671_v62, %v655_v46 }
 0x7ec   :  { %v693_v63 = vpop.permute.xlu1 %692 }
 0x7ed   :  { %v1844_v49 = vmul.f32 %v693_v63, %v677_v52 }
 0x7ef   :  { %v708_v1 = vpack.c.bf16 %v1844_v49, %v1842_v0 }
 0x7f1   :  { %710 = vrot.lane.b32.xlu0 %v708_v1, %s1623_s6 }
 0x863   :  { %v711_v2 = vpop.permute.xlu0 %710 }
 0x864   :  { %1430 = vmatmul.mubr.msk.bf16.vlgmr.msra.gmra.mrb[12].mxu1 %vm69_vm0, %v711_v2 }
 0x865   :  { %936 = vmatpush1.bf16.msra.mxu1 %v1700_v7  ;;  %967 = vmatprep.mubr.bf16.mxu1 %v1624_v19 }
 0x866   :  { %937 = vmatprep.subr.bf16.mxu1 %v1722_v12 }
 0x869   :  { %938 = vmatpush1.bf16.msra.mxu1 %v1727_v13 }
 0x86a   :  { %1155 = vmatprep.subr.bf16.mxu1 %v1695_v6 }
 0x937   :  { %v749_v3 = vpop.f32.mrb[12].mxu1 }
 0x938   :  { %v758_v4 = vadd.f32 %v749_v3, %v1768_v29  ;;  %v751_v5 = vpop.f32.mrb[13].mxu1 }
 0x939   :  { %v752_v8 = vpop.f32.mrb[14].mxu1 }
 0x93a   :  { %1562 = vtanh.f32 %v758_v4  ;;  %v753_v9 = vpop.f32.mrb[15].mxu1  ;;  %v762_v15 = vmul.f32 0.5, %v758_v4 }
 0x93b   :  { %v761_v10 = vadd.f32 %v753_v9, %v1790_v51 }
 0x93d   :  { %1564 = vtanh.f32 %v761_v10  ;;  %v784_v18 = vmul.f32 0.5, %v761_v10 }
 0x93e   :  { %1566 = vtanh.f32 %v762_v15 }
 0x93f   :  { %1568 = vtanh.f32 %v784_v18 }
 0x944   :  { %v1563_v11 = vpop.eup %1562 }
 0x945   :  { %769 = vrot.lane.b32.xlu1 %v1563_v11, %s1625_s3 }
 0x947   :  { %v1565_v14 = vpop.eup %1564 }
 0x948   :  { %791 = vrot.lane.b32.xlu0 %v1565_v14, %s1625_s3  ;;  %v1567_v6 = vpop.eup %1566 }
 0x949   :  { %v1569_v20 = vpop.eup %1568  ;;  %v764_v29 = vadd.f32 1.0, %v1567_v6 }
 0x94a   :  { %v786_v21 = vadd.f32 1.0, %v1569_v20 }
 0x94b   :  { %v765_v22 = vmul.f32 0.5, %v764_v29 }
 0x94c   :  { %v787_v26 = vmul.f32 0.5, %v786_v21 }
 0x94d   :  { %v767_v28 = vmul.f32 %v765_v22, %v667_v57 }
 0x94e   :  { %v789_v38 = vmul.f32 %v787_v26, %v689_v32 }
 0x9b7   :  { %v770_v23 = vpop.permute.xlu1 %769 }
 0x9b8   :  { %v772_v24 = vmul.f32 %v770_v23, %v765_v22 }
 0x9ba   :  { %774 = vrot.lane.b32.xlu1 %v772_v24, %s1623_s6  ;;  %v792_v51 = vpop.permute.xlu0 %791 }
 0x9bb   :  { %v794_v27 = vmul.f32 %v792_v51, %v787_v26 }
 0x9bd   :  { %796 = vrot.lane.b32.xlu0 %v794_v27, %s1623_s6 }
 0xa2c   :  { %v775_v30 = vpop.permute.xlu1 %774 }
 0xa2d   :  { %v777_v31 = vadd.f32 %v775_v30, %v767_v28 }
 0xa2f   :  { %1570 = vtanh.f32 %v777_v31  ;;  %v797_v40 = vpop.permute.xlu0 %796 }
 0xa30   :  { %v799_v42 = vadd.f32 %v797_v40, %v789_v38 }
 0xa32   :  { %1572 = vtanh.f32 %v799_v42 }
 0xa39   :  { %v1571_v25 = vpop.eup %1570 }
 0xa3a   :  { %780 = vrot.lane.b32.xlu1 %v1571_v25, %s1625_s3 }
 0xa3c   :  { %v1573_v44 = vpop.eup %1572 }
 0xa3d   :  { %802 = vrot.lane.b32.xlu0 %v1573_v44, %s1625_s3 }
 0xaac   :  { %v781_v46 = vpop.permute.xlu1 %780 }
 0xaad   :  { %v1863_v50 = vmul.f32 %v781_v46, %v765_v22 }
 0xaaf   :  { %v803_v47 = vpop.permute.xlu0 %802 }
 0xab0   :  { %v1865_v52 = vmul.f32 %v803_v47, %v787_v26 }
 0xab2   :  { %v818_v55 = vpack.c.bf16 %v1865_v52, %v1863_v50 }
 0xab4   :  { %820 = vrot.lane.b32.xlu1 %v818_v55, %s1623_s6 }
 0xb26   :  { %v821_v53 = vpop.permute.xlu1 %820 }
 0xb27   :  { %1431 = vmatmul.mubr.msk.bf16.vlgmr.msra.gmra.mrb[16].mxu0 %vm69_vm0, %v821_v53 }
 0xb28   :  { %1046 = vmatpush1.bf16.msra.mxu0 %v1700_v7  ;;  %1077 = vmatprep.mubr.bf16.mxu0 %v1624_v19 }
 0xb29   :  { %1047 = vmatprep.subr.bf16.mxu0 %v1722_v12 }
 0xb2c   :  { %1048 = vmatpush1.bf16.msra.mxu0 %v1727_v13 }
 0xbfa   :  { %v859_v54 = vpop.f32.mrb[16].mxu0 }
 0xbfb   :  { %v868_v56 = vadd.f32 %v859_v54, %v1782_v43  ;;  %v861_v57 = vpop.f32.mrb[17].mxu0 }
 0xbfc   :  { %v862_v58 = vpop.f32.mrb[18].mxu0 }
 0xbfd   :  { %1574 = vtanh.f32 %v868_v56  ;;  %v863_v59 = vpop.f32.mrb[19].mxu0  ;;  %v872_v62 = vmul.f32 0.5, %v868_v56 }
 0xbfe   :  { %v871_v32 = vadd.f32 %v863_v59, %v1776_v37 }
 0xc00   :  { %1576 = vtanh.f32 %v871_v32  ;;  %v894_v63 = vmul.f32 0.5, %v871_v32 }
 0xc01   :  { %1578 = vtanh.f32 %v872_v62 }
 0xc02   :  { %1580 = vtanh.f32 %v894_v63 }
 0xc07   :  { %v1575_v60 = vpop.eup %1574 }
 0xc08   :  { %879 = vrot.lane.b32.xlu0 %v1575_v60, %s1625_s3 }
 0xc0a   :  { %v1577_v61 = vpop.eup %1576 }
 0xc0b   :  { %901 = vrot.lane.b32.xlu1 %v1577_v61, %s1625_s3  ;;  %v1579_v1 = vpop.eup %1578 }
 0xc0c   :  { %v1581_v2 = vpop.eup %1580  ;;  %v874_v43 = vadd.f32 1.0, %v1579_v1 }
 0xc0d   :  { %v896_v3 = vadd.f32 1.0, %v1581_v2 }
 0xc0e   :  { %v875_v4 = vmul.f32 0.5, %v874_v43 }
 0xc0f   :  { %v897_v9 = vmul.f32 0.5, %v896_v3 }
 0xc10   :  { %v877_v11 = vmul.f32 %v875_v4, %v777_v31 }
 0xc11   :  { %v899_v18 = vmul.f32 %v897_v9, %v799_v42 }
 0xc7a   :  { %v880_v5 = vpop.permute.xlu0 %879 }
 0xc7b   :  { %v882_v8 = vmul.f32 %v880_v5, %v875_v4 }
 0xc7d   :  { %884 = vrot.lane.b32.xlu0 %v882_v8, %s1623_s6  ;;  %v902_v37 = vpop.permute.xlu1 %901 }
 0xc7e   :  { %v904_v10 = vmul.f32 %v902_v37, %v897_v9 }
 0xc80   :  { %906 = vrot.lane.b32.xlu1 %v904_v10, %s1623_s6 }
 0xcef   :  { %v885_v14 = vpop.permute.xlu0 %884 }
 0xcf0   :  { %v887_v15 = vadd.f32 %v885_v14, %v877_v11 }
 0xcf2   :  { %1582 = vtanh.f32 %v887_v15  ;;  %v907_v6 = vpop.permute.xlu1 %906 }
 0xcf3   :  { %v909_v20 = vadd.f32 %v907_v6, %v899_v18 }
 0xcf5   :  { %1584 = vtanh.f32 %v909_v20 }
 0xcfc   :  { %v1583_v29 = vpop.eup %1582 }
 0xcfd   :  { %890 = vrot.lane.b32.xlu0 %v1583_v29, %s1625_s3 }
 0xcff   :  { %v1585_v21 = vpop.eup %1584 }
 0xd00   :  { %912 = vrot.lane.b32.xlu1 %v1585_v21, %s1625_s3 }
 0xd6f   :  { %v891_v22 = vpop.permute.xlu0 %890 }
 0xd70   :  { %v1883_v24 = vmul.f32 %v891_v22, %v875_v4 }
 0xd72   :  { %v913_v23 = vpop.permute.xlu1 %912 }
 0xd73   :  { %v1885_v26 = vmul.f32 %v913_v23, %v897_v9 }
 0xd75   :  { %v928_v51 = vpack.c.bf16 %v1885_v26, %v1883_v24 }
 0xd77   :  { %930 = vrot.lane.b32.xlu0 %v928_v51, %s1623_s6 }
 0xde9   :  { %v931_v27 = vpop.permute.xlu0 %930 }
 0xdea   :  { %1432 = vmatmul.mubr.msk.bf16.vlgmr.msra.gmra.mrb[16].mxu1 %vm69_vm0, %v931_v27 }
 0xdeb   :  { %1156 = vmatpush1.bf16.msra.mxu1 %v1700_v7  ;;  %1187 = vmatprep.mubr.bf16.mxu1 %v1624_v19 }
 0xdec   :  { %1157 = vmatprep.subr.bf16.mxu1 %v1722_v12 }
 0xdef   :  { %1158 = vmatpush1.bf16.msra.mxu1 %v1727_v13 }
 0xebd   :  { %v969_v28 = vpop.f32.mrb[16].mxu1 }
 0xebe   :  { %v978_v30 = vadd.f32 %v969_v28, %v1786_v48  ;;  %v971_v31 = vpop.f32.mrb[17].mxu1 }
 0xebf   :  { %v972_v38 = vpop.f32.mrb[18].mxu1 }
 0xec0   :  { %1586 = vtanh.f32 %v978_v30  ;;  %v973_v40 = vpop.f32.mrb[19].mxu1  ;;  %v982_v19 = vmul.f32 0.5, %v978_v30 }
 0xec1   :  { %v981_v42 = vadd.f32 %v973_v40, %v1772_v33 }
 0xec3   :  { %1588 = vtanh.f32 %v981_v42  ;;  %v1004_v12 = vmul.f32 0.5, %v981_v42 }
 0xec4   :  { %1590 = vtanh.f32 %v982_v19 }
 0xec5   :  { %1592 = vtanh.f32 %v1004_v12 }
 0xeca   :  { %v1587_v25 = vpop.eup %1586 }
 0xecb   :  { %989 = vrot.lane.b32.xlu1 %v1587_v25, %s1625_s3 }
 0xecd   :  { %v1589_v7 = vpop.eup %1588 }
 0xece   :  { %1011 = vrot.lane.b32.xlu0 %v1589_v7, %s1625_s3  ;;  %v1591_v13 = vpop.eup %1590 }
 0xecf   :  { %v1593_v44 = vpop.eup %1592  ;;  %v984_v48 = vadd.f32 1.0, %v1591_v13 }
 0xed0   :  { %v1006_v46 = vadd.f32 1.0, %v1593_v44 }
 0xed1   :  { %v985_v47 = vmul.f32 0.5, %v984_v48 }
 0xed2   :  { %v1007_v54 = vmul.f32 0.5, %v1006_v46 }
 0xed3   :  { %v987_v57 = vmul.f32 %v985_v47, %v887_v15 }
 0xed4   :  { %v1009_v32 = vmul.f32 %v1007_v54, %v909_v20 }
 0xf3d   :  { %v990_v55 = vpop.permute.xlu1 %989 }
 0xf3e   :  { %v992_v53 = vmul.f32 %v990_v55, %v985_v47 }
 0xf40   :  { %994 = vrot.lane.b32.xlu1 %v992_v53, %s1623_s6  ;;  %v1012_v33 = vpop.permute.xlu0 %1011 }
 0xf41   :  { %v1014_v56 = vmul.f32 %v1012_v33, %v1007_v54 }
 0xf43   :  { %1016 = vrot.lane.b32.xlu0 %v1014_v56, %s1623_s6 }
 0xfb2   :  { %v995_v58 = vpop.permute.xlu1 %994 }
 0xfb3   :  { %v997_v59 = vadd.f32 %v995_v58, %v987_v57 }
 0xfb5   :  { %1594 = vtanh.f32 %v997_v59  ;;  %v1017_v60 = vpop.permute.xlu0 %1016 }
 0xfb6   :  { %v1019_v61 = vadd.f32 %v1017_v60, %v1009_v32 }
 0xfb8   :  { %1596 = vtanh.f32 %v1019_v61 }
 0xfbf   :  { %v1595_v62 = vpop.eup %1594 }
 0xfc0   :  { %1000 = vrot.lane.b32.xlu1 %v1595_v62, %s1625_s3 }
 0xfc2   :  { %v1597_v63 = vpop.eup %1596 }
 0xfc3   :  { %1022 = vrot.lane.b32.xlu0 %v1597_v63, %s1625_s3 }
0x1032   :  { %v1001_v1 = vpop.permute.xlu1 %1000 }
0x1033   :  { %v1903_v43 = vmul.f32 %v1001_v1, %v985_v47 }
0x1035   :  { %v1023_v2 = vpop.permute.xlu0 %1022 }
0x1036   :  { %v1905_v3 = vmul.f32 %v1023_v2, %v1007_v54 }
0x1038   :  { %v1038_v4 = vpack.c.bf16 %v1905_v3, %v1903_v43 }
0x103a   :  { %1040 = vrot.lane.b32.xlu1 %v1038_v4, %s1623_s6 }
0x10ac   :  { %v1041_v5 = vpop.permute.xlu1 %1040 }
0x10ad   :  { %1433 = vmatmul.mubr.msk.bf16.vlgmr.msra.gmra.mrb[20].mxu0 %vm69_vm0, %v1041_v5 }
0x1180   :  { %v1079_v8 = vpop.f32.mrb[20].mxu0 }
0x1181   :  { %v1088_v9 = vadd.f32 %v1079_v8, %v1780_v41  ;;  %v1081_v37 = vpop.f32.mrb[21].mxu0 }
0x1182   :  { %v1082_v10 = vpop.f32.mrb[22].mxu0 }
0x1183   :  { %1598 = vtanh.f32 %v1088_v9  ;;  %v1083_v11 = vpop.f32.mrb[23].mxu0  ;;  %v1092_v6 = vmul.f32 0.5, %v1088_v9 }
0x1184   :  { %v1091_v14 = vadd.f32 %v1083_v11, %v1778_v39 }
0x1186   :  { %1600 = vtanh.f32 %v1091_v14  ;;  %v1114_v20 = vmul.f32 0.5, %v1091_v14 }
0x1187   :  { %1602 = vtanh.f32 %v1092_v6 }
0x1188   :  { %1604 = vtanh.f32 %v1114_v20 }
0x118d   :  { %v1599_v15 = vpop.eup %1598 }
0x118e   :  { %1099 = vrot.lane.b32.xlu0 %v1599_v15, %s1625_s3 }
0x1190   :  { %v1601_v18 = vpop.eup %1600 }
0x1191   :  { %1121 = vrot.lane.b32.xlu1 %v1601_v18, %s1625_s3  ;;  %v1603_v29 = vpop.eup %1602 }
0x1192   :  { %v1605_v21 = vpop.eup %1604  ;;  %v1094_v41 = vadd.f32 1.0, %v1603_v29 }
0x1193   :  { %v1116_v22 = vadd.f32 1.0, %v1605_v21 }
0x1194   :  { %v1095_v23 = vmul.f32 0.5, %v1094_v41 }
0x1195   :  { %v1117_v28 = vmul.f32 0.5, %v1116_v22 }
0x1196   :  { %v1097_v31 = vmul.f32 %v1095_v23, %v997_v59 }
0x1197   :  { %v1119_v42 = vmul.f32 %v1117_v28, %v1019_v61 }
0x1200   :  { %v1100_v51 = vpop.permute.xlu0 %1099 }
0x1201   :  { %v1102_v27 = vmul.f32 %v1100_v51, %v1095_v23 }
0x1203   :  { %1104 = vrot.lane.b32.xlu0 %v1102_v27, %s1623_s6  ;;  %v1122_v39 = vpop.permute.xlu1 %1121 }
0x1204   :  { %v1124_v30 = vmul.f32 %v1122_v39, %v1117_v28 }
0x1206   :  { %1126 = vrot.lane.b32.xlu1 %v1124_v30, %s1623_s6 }
0x1275   :  { %v1105_v38 = vpop.permute.xlu0 %1104 }
0x1276   :  { %v1107_v40 = vadd.f32 %v1105_v38, %v1097_v31 }
0x1278   :  { %1606 = vtanh.f32 %v1107_v40  ;;  %v1127_v25 = vpop.permute.xlu1 %1126 }
0x1279   :  { %v1129_v7 = vadd.f32 %v1127_v25, %v1119_v42 }
0x127b   :  { %1608 = vtanh.f32 %v1129_v7 }
0x1282   :  { %v1607_v19 = vpop.eup %1606 }
0x1283   :  { %1110 = vrot.lane.b32.xlu0 %v1607_v19, %s1625_s3 }
0x1285   :  { %v1609_v12 = vpop.eup %1608 }
0x1286   :  { %1132 = vrot.lane.b32.xlu1 %v1609_v12, %s1625_s3 }
0x12f5   :  { %v1111_v13 = vpop.permute.xlu0 %1110 }
0x12f6   :  { %v1113_v48 = vmul.f32 %v1111_v13, %v1095_v23 }
0x12f8   :  { %v1133_v44 = vpop.permute.xlu1 %1132 }
0x12f9   :  { %v1135_v46 = vmul.f32 %v1133_v44, %v1117_v28 }
0x12fb   :  { %v1148_v47 = vpack.c.bf16 %v1135_v46, %v1113_v48 }
0x12fd   :  { %1150 = vrot.lane.b32.xlu0 %v1148_v47, %s1623_s6 }
0x136f   :  { %v1151_v55 = vpop.permute.xlu0 %1150 }
0x1370   :  { %1434 = vmatmul.mubr.msk.bf16.vlgmr.msra.gmra.mrb[20].mxu1 %vm69_vm0, %v1151_v55 }
0x1443   :  { %v1189_v53 = vpop.f32.mrb[20].mxu1 }
0x1444   :  { %v1198_v54 = vadd.f32 %v1189_v53, %v1784_v45  ;;  %v1191_v33 = vpop.f32.mrb[21].mxu1 }
0x1445   :  { %v1192_v56 = vpop.f32.mrb[22].mxu1 }
0x1446   :  { %1610 = vtanh.f32 %v1198_v54  ;;  %v1193_v57 = vpop.f32.mrb[23].mxu1  ;;  %v1201_v60 = vmul.f32 0.5, %v1198_v54 }
0x1447   :  { %v1200_v58 = vadd.f32 %v1193_v57, %v1774_v35 }
0x1449   :  { %1612 = vtanh.f32 %v1200_v58  ;;  %v1223_v61 = vmul.f32 0.5, %v1200_v58 }
0x144a   :  { %1614 = vtanh.f32 %v1201_v60 }
0x144b   :  { %1616 = vtanh.f32 %v1223_v61 }
0x1450   :  { %v1611_v59 = vpop.eup %1610 }
0x1451   :  { %1208 = vrot.lane.b32.xlu1 %v1611_v59, %s1625_s3 }
0x1453   :  { %v1613_v32 = vpop.eup %1612 }
0x1454   :  { %1230 = vrot.lane.b32.xlu0 %v1613_v32, %s1625_s3  ;;  %v1615_v62 = vpop.eup %1614 }
0x1455   :  { %v1617_v63 = vpop.eup %1616  ;;  %v1203_v45 = vadd.f32 1.0, %v1615_v62 }
0x1456   :  { %v1225_v1 = vadd.f32 1.0, %v1617_v63 }
0x1457   :  { %v1204_v2 = vmul.f32 0.5, %v1203_v45 }
0x1458   :  { %v1226_v8 = vmul.f32 0.5, %v1225_v1 }
0x1459   :  { %v1206_v37 = vmul.f32 %v1204_v2, %v1107_v40 }
0x145a   :  { %v1228_v14 = vmul.f32 %v1226_v8, %v1129_v7 }
0x14c3   :  { %v1209_v4 = vpop.permute.xlu1 %1208 }
0x14c4   :  { %v1211_v5 = vmul.f32 %v1209_v4, %v1204_v2 }
0x14c6   :  { %1213 = vrot.lane.b32.xlu1 %v1211_v5, %s1623_s6  ;;  %v1231_v35 = vpop.permute.xlu0 %1230 }
0x14c7   :  { %v1233_v9 = vmul.f32 %v1231_v35, %v1226_v8 }
0x14c9   :  { %1235 = vrot.lane.b32.xlu0 %v1233_v9, %s1623_s6 }
0x1538   :  { %v1214_v10 = vpop.permute.xlu1 %1213 }
0x1539   :  { %v1216_v11 = vadd.f32 %v1214_v10, %v1206_v37 }
0x153b   :  { %1618 = vtanh.f32 %v1216_v11  ;;  %v1236_v15 = vpop.permute.xlu0 %1235 }
0x153c   :  { %v1238_v18 = vadd.f32 %v1236_v15, %v1228_v14 }
0x153e   :  { %1620 = vtanh.f32 %v1238_v18 }
0x1545   :  { %v1619_v6 = vpop.eup %1618 }
0x1546   :  { %1219 = vrot.lane.b32.xlu1 %v1619_v6, %s1625_s3 }
0x1548   :  { %v1621_v20 = vpop.eup %1620 }
0x1549   :  { %1241 = vrot.lane.b32.xlu0 %v1621_v20, %s1625_s3 }
0x154a   :  { %478 = vrot.lane.b32.xlu1 %v1800_v34, %s1623_s6 }
0x154d   :  { %483 = vrot.lane.b32.xlu0 %v1802_v36, %s1623_s6 }
0x154e   :  { %587 = vrot.lane.b32.xlu1 %v1821_v16, %s1623_s6 }
0x1551   :  { %593 = vrot.lane.b32.xlu0 %v1823_v17, %s1623_s6 }
0x1552   :  { %697 = vrot.lane.b32.xlu1 %v1842_v0, %s1623_s6 }
0x1555   :  { %703 = vrot.lane.b32.xlu0 %v1844_v49, %s1623_s6 }
0x1556   :  { %807 = vrot.lane.b32.xlu1 %v1863_v50, %s1623_s6 }
0x1559   :  { %813 = vrot.lane.b32.xlu0 %v1865_v52, %s1623_s6 }
0x155a   :  { %917 = vrot.lane.b32.xlu1 %v1883_v24, %s1623_s6 }
0x155d   :  { %923 = vrot.lane.b32.xlu0 %v1885_v26, %s1623_s6 }
0x155e   :  { %1027 = vrot.lane.b32.xlu1 %v1903_v43, %s1623_s6 }
0x1561   :  { %1033 = vrot.lane.b32.xlu0 %v1905_v3, %s1623_s6 }
0x1562   :  { %1137 = vrot.lane.b32.xlu1 %v1113_v48, %s1623_s6 }
0x1565   :  { %1143 = vrot.lane.b32.xlu0 %v1135_v46, %s1623_s6 }
0x15b8   :  { %v1220_v34 = vpop.permute.xlu1 %1219 }
0x15b9   :  { %v1222_v36 = vmul.f32 %v1220_v34, %v1204_v2 }
0x15bb   :  { %1246 = vrot.lane.b32.xlu1 %v1222_v36, %s1623_s6  ;;  %v1242_v16 = vpop.permute.xlu0 %1241 }
0x15bc   :  { %v1244_v17 = vmul.f32 %v1242_v16, %v1226_v8  ;;  %v479_v0 = vpop.permute.xlu1 %478 }
0x15bd   :  { %481 = vst.msk [vmem:[#allocation4] sm:$0xff] %vm69_vm0, %v479_v0 }
0x15be   :  { %1252 = vrot.lane.b32.xlu0 %v1244_v17, %s1623_s6 }
0x15bf   :  { %1258 = vrot.lane.b32.xlu1 %v1216_v11, %s1626_s5  ;;  %v484_v49 = vpop.permute.xlu0 %483 }
0x15c0   :  { %487 = vst.msk [vmem:[#allocation5 + $0x38] sm:$0xff] %vm69_vm0, %v484_v49  ;;  %v588_v50 = vpop.permute.xlu1 %587 }
0x15c1   :  { %591 = vst.msk [vmem:[#allocation4 + $0x8] sm:$0xff] %vm69_vm0, %v588_v50 }
0x15c2   :  { %1264 = vrot.lane.b32.xlu0 %v1238_v18, %s1626_s5 }
0x15c3   :  { %v594_v52 = vpop.permute.xlu0 %593 }
0x15c4   :  { %v1268_v24 = vld [vmem:[#allocation4] sm:$0xff]  ;;  %597 = vst.msk [vmem:[#allocation5 + $0x30] sm:$0xff] %vm69_vm0, %v594_v52  ;;  %v698_v26 = vpop.permute.xlu1 %697 }
0x15c5   :  { %v1451_v43 = vpack.c.bf16 %v1268_v24, %v1268_v24  ;;  %701 = vst.msk [vmem:[#allocation4 + $0x10] sm:$0xff] %vm69_vm0, %v698_v26 }
0x15c7   :  { %1309 = vst.msk [vmem:[%s2048_s7] sm:$0xf] %vm1308_vm1, %v1451_v43  ;;  %v1324_v3 = vld [vmem:[#allocation5 + $0x38] sm:$0xff]  ;;  %v704_v29 = vpop.permute.xlu0 %703 }
0x15c8   :  { %v1466_v21 = vpack.c.bf16 %v1324_v3, %v1324_v3  ;;  %v1269_v41 = vld [vmem:[#allocation4 + $0x8] sm:$0xff]  ;;  %707 = vst.msk [vmem:[#allocation5 + $0x28] sm:$0xff] %vm69_vm0, %v704_v29  ;;  %v808_v22 = vpop.permute.xlu1 %807 }
0x15c9   :  { %v1452_v23 = vpack.c.bf16 %v1269_v41, %v1269_v41  ;;  %811 = vst.msk [vmem:[#allocation4 + $0x18] sm:$0xff] %vm69_vm0, %v808_v22 }
0x15ca   :  { %1364 = vst.msk [vmem:[%s2049_s8 + $0x1c] sm:$0xf] %vm1308_vm1, %v1466_v21 }
0x15cb   :  { %1310 = vst.msk [vmem:[%s2048_s7 + $0x4] sm:$0xf] %vm1308_vm1, %v1452_v23  ;;  %v1323_v51 = vld [vmem:[#allocation5 + $0x30] sm:$0xff]  ;;  %v814_v27 = vpop.permute.xlu0 %813 }
0x15cc   :  { %v1465_v28 = vpack.c.bf16 %v1323_v51, %v1323_v51  ;;  %v1270_v39 = vld [vmem:[#allocation4 + $0x10] sm:$0xff]  ;;  %817 = vst.msk [vmem:[#allocation5 + $0x20] sm:$0xff] %vm69_vm0, %v814_v27  ;;  %v918_v30 = vpop.permute.xlu1 %917 }
0x15cd   :  { %v1453_v31 = vpack.c.bf16 %v1270_v39, %v1270_v39  ;;  %921 = vst.msk [vmem:[#allocation4 + $0x20] sm:$0xff] %vm69_vm0, %v918_v30 }
0x15ce   :  { %1363 = vst.msk [vmem:[%s2049_s8 + $0x18] sm:$0xf] %vm1308_vm1, %v1465_v28 }
0x15cf   :  { %1311 = vst.msk [vmem:[%s2048_s7 + $0x8] sm:$0xf] %vm1308_vm1, %v1453_v31  ;;  %v1322_v38 = vld [vmem:[#allocation5 + $0x28] sm:$0xff]  ;;  %v924_v40 = vpop.permute.xlu0 %923 }
0x15d0   :  { %v1464_v42 = vpack.c.bf16 %v1322_v38, %v1322_v38  ;;  %v1271_v25 = vld [vmem:[#allocation4 + $0x18] sm:$0xff]  ;;  %927 = vst.msk [vmem:[#allocation5 + $0x18] sm:$0xff] %vm69_vm0, %v924_v40  ;;  %v1028_v7 = vpop.permute.xlu1 %1027 }
0x15d1   :  { %v1454_v19 = vpack.c.bf16 %v1271_v25, %v1271_v25  ;;  %1031 = vst.msk [vmem:[#allocation4 + $0x28] sm:$0xff] %vm69_vm0, %v1028_v7 }
0x15d2   :  { %1362 = vst.msk [vmem:[%s2049_s8 + $0x14] sm:$0xf] %vm1308_vm1, %v1464_v42 }
0x15d3   :  { %1312 = vst.msk [vmem:[%s2048_s7 + $0xc] sm:$0xf] %vm1308_vm1, %v1454_v19  ;;  %v1321_v12 = vld [vmem:[#allocation5 + $0x20] sm:$0xff]  ;;  %v1034_v13 = vpop.permute.xlu0 %1033 }
0x15d4   :  { %v1463_v44 = vpack.c.bf16 %v1321_v12, %v1321_v12  ;;  %v1272_v48 = vld [vmem:[#allocation4 + $0x20] sm:$0xff]  ;;  %1037 = vst.msk [vmem:[#allocation5 + $0x10] sm:$0xff] %vm69_vm0, %v1034_v13  ;;  %v1138_v46 = vpop.permute.xlu1 %1137 }
0x15d5   :  { %v1455_v47 = vpack.c.bf16 %v1272_v48, %v1272_v48  ;;  %1141 = vst.msk [vmem:[#allocation4 + $0x30] sm:$0xff] %vm69_vm0, %v1138_v46 }
0x15d6   :  { %1361 = vst.msk [vmem:[%s2049_s8 + $0x10] sm:$0xf] %vm1308_vm1, %v1463_v44 }
0x15d7   :  { %1313 = vst.msk [vmem:[%s2048_s7 + $0x10] sm:$0xf] %vm1308_vm1, %v1455_v47  ;;  %v1320_v55 = vld [vmem:[#allocation5 + $0x18] sm:$0xff]  ;;  %v1144_v53 = vpop.permute.xlu0 %1143 }
0x15d8   :  { %v1462_v54 = vpack.c.bf16 %v1320_v55, %v1320_v55  ;;  %v1273_v33 = vld [vmem:[#allocation4 + $0x28] sm:$0xff]  ;;  %1147 = vst.msk [vmem:[#allocation5 + $0x8] sm:$0xff] %vm69_vm0, %v1144_v53 }
0x15d9   :  { %v1456_v56 = vpack.c.bf16 %v1273_v33, %v1273_v33 }
0x15da   :  { %1360 = vst.msk [vmem:[%s2049_s8 + $0xc] sm:$0xf] %vm1308_vm1, %v1462_v54 }
0x15db   :  { %1314 = vst.msk [vmem:[%s2048_s7 + $0x14] sm:$0xf] %vm1308_vm1, %v1456_v56  ;;  %v1319_v57 = vld [vmem:[#allocation5 + $0x10] sm:$0xff] }
0x15dc   :  { %v1461_v58 = vpack.c.bf16 %v1319_v57, %v1319_v57  ;;  %v1274_v59 = vld [vmem:[#allocation4 + $0x30] sm:$0xff] }
0x15dd   :  { %v1457_v32 = vpack.c.bf16 %v1274_v59, %v1274_v59 }
0x15de   :  { %1359 = vst.msk [vmem:[%s2049_s8 + $0x8] sm:$0xf] %vm1308_vm1, %v1461_v58 }
0x15df   :  { %1315 = vst.msk [vmem:[%s2048_s7 + $0x18] sm:$0xf] %vm1308_vm1, %v1457_v32  ;;  %v1318_v60 = vld [vmem:[#allocation5 + $0x8] sm:$0xff] }
0x15e0   :  { %v1460_v61 = vpack.c.bf16 %v1318_v60, %v1318_v60 }
0x15e2   :  { %1358 = vst.msk [vmem:[%s2049_s8 + $0x4] sm:$0xf] %vm1308_vm1, %v1460_v61 }
0x162d   :  { %v1247_v62 = vpop.permute.xlu1 %1246 }
0x162e   :  { %1250 = vst.msk [vmem:[#allocation4 + $0x38] sm:$0xff] %vm69_vm0, %v1247_v62  ;;  %1256 = vst.msk [vmem:[#allocation6] sm:$0xff] %vm69_vm0, %v1247_v62 }
0x1630   :  { %v1253_v63 = vpop.permute.xlu0 %1252 }
0x1631   :  { %1255 = vst.msk [vmem:[#allocation5] sm:$0xff] %vm69_vm0, %v1253_v63  ;;  %1262 = vst.msk [vmem:[#allocation8] sm:$0xff] %vm69_vm0, %v1253_v63  ;;  %v1259_v45 = vpop.permute.xlu1 %1258 }
0x1632   :  { %1261 = vst.msk [vmem:[#allocation7] sm:$0xff] %vm69_vm0, %v1259_v45 }
0x1634   :  { %v1265_v1 = vpop.permute.xlu0 %1264 }
0x1635   :  { %v1275_v2 = vld [vmem:[#allocation4 + $0x38] sm:$0xff]  ;;  %1267 = vst.msk [vmem:[#allocation9] sm:$0xff] %vm69_vm0, %v1265_v1 }
0x1636   :  { %v1458_v4 = vpack.c.bf16 %v1275_v2, %v1275_v2 }
0x1638   :  { %1316 = vst.msk [vmem:[%s2048_s7 + $0x1c] sm:$0xf] %vm1308_vm1, %v1458_v4  ;;  %v1317_v5 = vld [vmem:[#allocation5] sm:$0xff] }
0x1639   :  { %v1459_v8 = vpack.c.bf16 %v1317_v5, %v1317_v5 }
0x163b   :  { %1357 = vst.msk [vmem:[%s2049_s8] sm:$0xf] %vm1308_vm1, %v1459_v8 }

</bundles_post_ra>
